<compile_context>
chip_gen: v7x
topology: tpu7x:2x2x1
jax: 0.10.0
libtpu: 0.0.40
codegen_flags: <defaults>
</compile_context>

<pallas_src>
import functools

import jax
import jax.numpy as jnp
from jax import lax
from jax.experimental import pallas as pl
from jax.experimental.pallas import tpu as pltpu


def _round_up(x, m):
    return ((x + m - 1) // m) * m


@functools.lru_cache(maxsize=1)
def _vmem_capacity_bytes():
    """Per-core VMEM capacity; conservative fallback if the query is unavailable."""
    try:
        return int(pltpu.get_tpu_info().vmem_capacity_bytes)
    except Exception:
        return 64 << 20  # v7x per-TC size -- safe lower bound everywhere


def _make_mlp_kernel(n_layers, sub_b, n_sub, compute_dtype):
    """Fused (Linear -> ReLU) x n_layers kernel for one (bb, D_pad) batch tile."""

    def kernel(x_ref, *args):
        o_ref = args[-1]
        wb = args[:-1]
        # Bias loads hoisted: loaded once per grid step, reused by every
        # sub-chunk (JAX does not CSE broadcast/loads inside unrolled loops).
        biases = tuple(wb[2 * li + 1][...] for li in range(n_layers))

        def layers(h):
            # h enters in compute_dtype; bias-add + ReLU epilogue stays in f32,
            # and only the compute-dtype copy stays live across layers.
            for li in range(n_layers):
                y = jnp.dot(h, wb[2 * li][...],
                            preferred_element_type=jnp.float32)
                y = jnp.maximum(y + biases[li], 0.0)
                h = y.astype(compute_dtype) if li < n_layers - 1 else y
            return h

        if n_sub == 1:
            o_ref[...] = layers(x_ref[...].astype(compute_dtype)).astype(o_ref.dtype)
        else:
            def sub_block(s, carry):
                row0 = pl.multiple_of(s * sub_b, sub_b)
                h = layers(x_ref[pl.ds(row0, sub_b), :].astype(compute_dtype))
                o_ref[pl.ds(row0, sub_b), :] = h.astype(o_ref.dtype)
                return carry

            lax.fori_loop(0, n_sub, sub_block, 0, unroll=True)

    return kernel


def prepare_params(params, compute_dtype=jnp.bfloat16):
    """One-time pad + cast of weights/biases to lane-aligned (128) shapes.

    params: list of (W, b) with W: (in, out) = W_pt.T and b: (1, out).
    Doing this outside the hot forward avoids re-reading/re-writing all weight
    bytes on every invocation.
    """
    dims = (params[0][0].shape[0],) + tuple(w.shape[1] for w, _ in params)
    dims_p = tuple(_round_up(d, 128) for d in dims)
    flat = []
    for li, (w, b) in enumerate(params):
        w_p = jnp.zeros((dims_p[li], dims_p[li + 1]), compute_dtype)
        w_p = w_p.at[:dims[li], :dims[li + 1]].set(w.astype(compute_dtype))
        b_p = jnp.zeros((1, dims_p[li + 1]), jnp.float32)
        b_p = b_p.at[:, :dims[li + 1]].set(b.astype(jnp.float32).reshape(1, -1))
        flat.extend([w_p, b_p])
    return {"dims": dims, "dims_p": dims_p,
            "compute_dtype": compute_dtype, "flat": tuple(flat)}


@functools.partial(
    jax.jit,
    static_argnames=("dims", "dims_p", "block_b", "compute_dtype",
                     "weight_buffers"))
def _mlp_forward_impl(x2, flat_params, *, dims, dims_p, block_b,
                      compute_dtype, weight_buffers):
    n_layers = len(dims) - 1
    B = x2.shape[0]

    # ---- batch tiling: big tiles amortize the ~0.35us per-grid-step overhead.
    bb = min(block_b, _round_up(B, 8))
    # Guarantee >= 2 grid steps when the batch is big enough, so both v7x TCs
    # get work under dimension_semantics=("parallel",).
    if _round_up(B, bb) // bb < 2 and B > 8:
        bb = _round_up((B + 1) // 2, 8)
    B_p = _round_up(B, bb)
    grid = B_p // bb

    # ---- adaptive sub-chunking: only chunk when the widest live activation
    #      (bb x max_d, f32 + compute copy) would be large; otherwise a single
    #      pass avoids redundant MXU weight re-pushes per sub-chunk.
    max_d = max(dims_p)
    if bb % 128 != 0 or bb * max_d * 6 <= (4 << 20):
        sub_b = bb
    else:
        sub_b = 128
        while bb % (2 * sub_b) == 0 and 2 * sub_b * max_d * 6 <= (4 << 20):
            sub_b *= 2
    n_sub = bb // sub_b

    # ---- input padding only when actually needed (static shape check).
    if B_p != B or dims_p[0] != dims[0]:
        x_p = jnp.zeros((B_p, dims_p[0]), x2.dtype).at[:B, :dims[0]].set(x2)
    else:
        x_p = x2

    # ---- BlockSpecs: weights/biases have constant index_maps (VMEM-resident);
    #      single-buffer them when supported to halve their VMEM footprint.
    wb_kwargs = {"pipeline_mode": pl.Buffered(1)} if weight_buffers == 1 else {}
    in_specs = [pl.BlockSpec((bb, dims_p[0]), lambda i: (i, 0))]
    for li in range(n_layers):
        w, b = flat_params[2 * li], flat_params[2 * li + 1]
        in_specs.append(pl.BlockSpec(w.shape, lambda i: (0, 0), **wb_kwargs))
        in_specs.append(pl.BlockSpec(b.shape, lambda i: (0, 0), **wb_kwargs))
    out_specs = pl.BlockSpec((bb, dims_p[-1]), lambda i: (i, 0))

    # ---- VMEM budget: size from the real footprint, cap by the chip's actual
    #      capacity (128 MiB on v5e/v6e, 64 MiB per TC on v7x).
    c_isz = jnp.dtype(compute_dtype).itemsize
    io_isz = x_p.dtype.itemsize
    w_bytes = sum(dims_p[i] * dims_p[i + 1] for i in range(n_layers)) * c_isz
    b_bytes = sum(dims_p[1:]) * 4
    wb_bufs = 1 if weight_buffers == 1 else 2
    io_bytes = 2 * bb * dims_p[0] * io_isz + 2 * bb * dims_p[-1] * io_isz
    act_bytes = 2 * sub_b * max_d * (4 + c_isz)
    need = wb_bufs * (w_bytes + b_bytes) + io_bytes + act_bytes + (8 << 20)
    cap = int(_vmem_capacity_bytes() * 0.85)
    # TODO(synk): when `need > cap` (input_dim >~ 512 on v7x), stream the two
    # widest layers' weights via an N-tiled grid / pltpu.emit_pipeline instead
    # of full residency.
    vmem_limit = min(max(need, 1 << 20), cap)

    kernel = _make_mlp_kernel(n_layers, sub_b, n_sub, compute_dtype)

    out = pl.pallas_call(
        kernel,
        out_shape=jax.ShapeDtypeStruct((B_p, dims_p[-1]), x2.dtype),
        grid_spec=pltpu.PrefetchScalarGridSpec(
            num_scalar_prefetch=0,
            grid=(grid,),
            in_specs=in_specs,
            out_specs=out_specs,
        ),
        compiler_params=pltpu.CompilerParams(
            dimension_semantics=("parallel",),
            vmem_limit_bytes=vmem_limit,
        ),
    )(x_p, *flat_params)

    if B_p != B or dims_p[-1] != dims[-1]:
        out = out[:B, :dims[-1]]
    return out


# Lazily resolved: 1 if single-buffered (pl.Buffered(1)) weight specs compile
# on this JAX/libtpu, else 0 (default double-buffering).
_WEIGHT_BUFFERS = None


def mlp_forward(x, prepared, block_b=1024):
    """x: [..., D]. `prepared` comes from prepare_params(). Returns [..., D]."""
    global _WEIGHT_BUFFERS
    dims, dims_p = prepared["dims"], prepared["dims_p"]
    orig_shape = x.shape
    assert orig_shape[-1] == dims[0], "input feature dim mismatch"
    x2 = x.reshape(-1, dims[0])
    kw = dict(dims=dims, dims_p=dims_p, block_b=block_b,
              compute_dtype=prepared["compute_dtype"])
    if _WEIGHT_BUFFERS is None:
        try:
            out = jax.block_until_ready(
                _mlp_forward_impl(x2, prepared["flat"], weight_buffers=1, **kw))
            _WEIGHT_BUFFERS = 1
        except Exception:
            # Buffered(1) not supported here -> default double buffering.
            _WEIGHT_BUFFERS = 0
            out = _mlp_forward_impl(x2, prepared["flat"], weight_buffers=0, **kw)
    else:
        out = _mlp_forward_impl(x2, prepared["flat"],
                                weight_buffers=_WEIGHT_BUFFERS, **kw)
    return out.reshape(*orig_shape[:-1], dims[-1])


def init_params(key, input_dim):
    """nn.Linear-style init; weights stored as (in, out) = W_pt.T."""
    dims = [input_dim, input_dim * 2, input_dim * 4, input_dim * 8,
            input_dim * 4, input_dim * 2, input_dim]
    params = []
    for i in range(6):
        fan_in, fan_out = dims[i], dims[i + 1]
        key, kw_, kb = jax.random.split(key, 3)
        bound = 1.0 / jnp.sqrt(fan_in)
        w = jax.random.uniform(kw_, (fan_in, fan_out), jnp.float32, -bound, bound)
        b = jax.random.uniform(kb, (1, fan_out), jnp.float32, -bound, bound)
        params.append((w, b))
    return params


def mlp_reference(x, params, compute_dtype=jnp.float32):
    """Pure-JAX reference mirroring the kernel's compute dtype."""
    h = x.astype(jnp.float32)
    for (w, b) in params:
        y = jnp.dot(h.astype(compute_dtype), w.astype(compute_dtype),
                    preferred_element_type=jnp.float32)
        h = jnp.maximum(y + b.astype(jnp.float32), 0.0)
    return h


if __name__ == "__main__":
    key = jax.random.PRNGKey(0)
    key, kx = jax.random.split(key)

    input_dim = 32
    batch = 8

    x = jax.random.normal(kx, (batch, input_dim), jnp.float32)
    params = init_params(key, input_dim)

    # 1) f32 compute path: bit-faithful to the PyTorch forward semantics.
    prep_f32 = prepare_params(params, compute_dtype=jnp.float32)
    out_f32 = jax.block_until_ready(mlp_forward(x, prep_f32))
    ref_f32 = mlp_reference(x, params, jnp.float32)
    assert out_f32.shape == (batch, input_dim)
    assert jnp.allclose(out_f32, ref_f32, atol=1e-4, rtol=1e-4), "f32 mismatch"

    # 2) Performance path: bf16 MXU matmuls with f32 accumulation/epilogue.
    prep_bf16 = prepare_params(params, compute_dtype=jnp.bfloat16)
    out_bf16 = jax.block_until_ready(mlp_forward(x, prep_bf16))
    ref_bf16 = mlp_reference(x, params, jnp.bfloat16)
    assert out_bf16.shape == (batch, input_dim)
    assert jnp.allclose(out_bf16, ref_bf16, atol=2e-3, rtol=2e-3), "bf16 mismatch"
    assert jnp.allclose(out_bf16, ref_f32, atol=5e-2, rtol=5e-2), "bf16 vs f32 drift"

    print("KERNEL_OK")
</pallas_src>

<mosaic_0001>
module attributes {stable_mosaic.version = 11 : i64} {
  func.func @kernel(%arg0: i32, %arg1: memref<8x128xf32, #tpu.memory_space<vmem>>, %arg2: memref<128x128xf32, #tpu.memory_space<vmem>>, %arg3: memref<1x128xf32, #tpu.memory_space<vmem>>, %arg4: memref<128x128xf32, #tpu.memory_space<vmem>>, %arg5: memref<1x128xf32, #tpu.memory_space<vmem>>, %arg6: memref<128x256xf32, #tpu.memory_space<vmem>>, %arg7: memref<1x256xf32, #tpu.memory_space<vmem>>, %arg8: memref<256x128xf32, #tpu.memory_space<vmem>>, %arg9: memref<1x128xf32, #tpu.memory_space<vmem>>, %arg10: memref<128x128xf32, #tpu.memory_space<vmem>>, %arg11: memref<1x128xf32, #tpu.memory_space<vmem>>, %arg12: memref<128x128xf32, #tpu.memory_space<vmem>>, %arg13: memref<1x128xf32, #tpu.memory_space<vmem>>, %arg14: memref<8x128xf32, #tpu.memory_space<vmem>>) attributes {dimension_semantics = [#tpu.dimension_semantics<parallel>], iteration_bounds = array<i64: 1>, scalar_prefetch = 0 : i64, scratch_operands = 0 : i64, tpu.core_type = #tpu.core_type<tc>, window_params = [{transform_indices = @transform_0, window_bounds = array<i64: 8, 128>}, {pipeline_mode = #tpu.pipeline_mode<synchronous>, transform_indices = @transform_1, window_bounds = array<i64: 128, 128>}, {pipeline_mode = #tpu.pipeline_mode<synchronous>, transform_indices = @transform_2, window_bounds = array<i64: 1, 128>}, {pipeline_mode = #tpu.pipeline_mode<synchronous>, transform_indices = @transform_3, window_bounds = array<i64: 128, 128>}, {pipeline_mode = #tpu.pipeline_mode<synchronous>, transform_indices = @transform_4, window_bounds = array<i64: 1, 128>}, {pipeline_mode = #tpu.pipeline_mode<synchronous>, transform_indices = @transform_5, window_bounds = array<i64: 128, 256>}, {pipeline_mode = #tpu.pipeline_mode<synchronous>, transform_indices = @transform_6, window_bounds = array<i64: 1, 256>}, {pipeline_mode = #tpu.pipeline_mode<synchronous>, transform_indices = @transform_7, window_bounds = array<i64: 256, 128>}, {pipeline_mode = #tpu.pipeline_mode<synchronous>, transform_indices = @transform_8, window_bounds = array<i64: 1, 128>}, {pipeline_mode = #tpu.pipeline_mode<synchronous>, transform_indices = @transform_9, window_bounds = array<i64: 128, 128>}, {pipeline_mode = #tpu.pipeline_mode<synchronous>, transform_indices = @transform_10, window_bounds = array<i64: 1, 128>}, {pipeline_mode = #tpu.pipeline_mode<synchronous>, transform_indices = @transform_11, window_bounds = array<i64: 128, 128>}, {pipeline_mode = #tpu.pipeline_mode<synchronous>, transform_indices = @transform_12, window_bounds = array<i64: 1, 128>}, {transform_indices = @transform_13, window_bounds = array<i64: 8, 128>}]} {
    %c0 = arith.constant 0 : index
    %c0_0 = arith.constant 0 : index
    %0 = vector.load %arg3[%c0, %c0_0] : memref<1x128xf32, #tpu.memory_space<vmem>>, vector<1x128xf32>
    %c0_1 = arith.constant 0 : index
    %c0_2 = arith.constant 0 : index
    %1 = vector.load %arg5[%c0_1, %c0_2] : memref<1x128xf32, #tpu.memory_space<vmem>>, vector<1x128xf32>
    %c0_3 = arith.constant 0 : index
    %c0_4 = arith.constant 0 : index
    %2 = vector.load %arg7[%c0_3, %c0_4] : memref<1x256xf32, #tpu.memory_space<vmem>>, vector<1x256xf32>
    %c0_5 = arith.constant 0 : index
    %c0_6 = arith.constant 0 : index
    %3 = vector.load %arg9[%c0_5, %c0_6] : memref<1x128xf32, #tpu.memory_space<vmem>>, vector<1x128xf32>
    %c0_7 = arith.constant 0 : index
    %c0_8 = arith.constant 0 : index
    %4 = vector.load %arg11[%c0_7, %c0_8] : memref<1x128xf32, #tpu.memory_space<vmem>>, vector<1x128xf32>
    %c0_9 = arith.constant 0 : index
    %c0_10 = arith.constant 0 : index
    %5 = vector.load %arg13[%c0_9, %c0_10] : memref<1x128xf32, #tpu.memory_space<vmem>>, vector<1x128xf32>
    %c0_11 = arith.constant 0 : index
    %c0_12 = arith.constant 0 : index
    %6 = vector.load %arg1[%c0_11, %c0_12] : memref<8x128xf32, #tpu.memory_space<vmem>>, vector<8x128xf32>
    %c0_13 = arith.constant 0 : index
    %c0_14 = arith.constant 0 : index
    %7 = vector.load %arg2[%c0_13, %c0_14] : memref<128x128xf32, #tpu.memory_space<vmem>>, vector<128x128xf32>
    %cst = arith.constant dense<0.000000e+00> : vector<8x128xf32>
    %8 = tpu.matmul %6, %7, %cst {dimension_numbers = #tpu.dot_dimension_numbers<[1], [0], [0], [1], [0, 0, 1, 1], [], []>} : vector<8x128xf32>, vector<128x128xf32>, vector<8x128xf32> -> vector<8x128xf32>
    %9 = vector.broadcast %0 : vector<1x128xf32> to vector<8x128xf32>
    %10 = arith.addf %8, %9 : vector<8x128xf32>
    %cst_15 = arith.constant 0.000000e+00 : f32
    %11 = vector.broadcast %cst_15 : f32 to vector<8x128xf32>
    %12 = arith.maximumf %10, %11 : vector<8x128xf32>
    %c0_16 = arith.constant 0 : index
    %c0_17 = arith.constant 0 : index
    %13 = vector.load %arg4[%c0_16, %c0_17] : memref<128x128xf32, #tpu.memory_space<vmem>>, vector<128x128xf32>
    %cst_18 = arith.constant dense<0.000000e+00> : vector<8x128xf32>
    %14 = tpu.matmul %12, %13, %cst_18 {dimension_numbers = #tpu.dot_dimension_numbers<[1], [0], [0], [1], [0, 0, 1, 1], [], []>} : vector<8x128xf32>, vector<128x128xf32>, vector<8x128xf32> -> vector<8x128xf32>
    %15 = vector.broadcast %1 : vector<1x128xf32> to vector<8x128xf32>
    %16 = arith.addf %14, %15 : vector<8x128xf32>
    %cst_19 = arith.constant 0.000000e+00 : f32
    %17 = vector.broadcast %cst_19 : f32 to vector<8x128xf32>
    %18 = arith.maximumf %16, %17 : vector<8x128xf32>
    %c0_20 = arith.constant 0 : index
    %c0_21 = arith.constant 0 : index
    %19 = vector.load %arg6[%c0_20, %c0_21] : memref<128x256xf32, #tpu.memory_space<vmem>>, vector<128x256xf32>
    %cst_22 = arith.constant dense<0.000000e+00> : vector<8x256xf32>
    %20 = tpu.matmul %18, %19, %cst_22 {dimension_numbers = #tpu.dot_dimension_numbers<[1], [0], [0], [1], [0, 0, 1, 1], [], []>} : vector<8x128xf32>, vector<128x256xf32>, vector<8x256xf32> -> vector<8x256xf32>
    %21 = vector.broadcast %2 : vector<1x256xf32> to vector<8x256xf32>
    %22 = arith.addf %20, %21 : vector<8x256xf32>
    %cst_23 = arith.constant 0.000000e+00 : f32
    %23 = vector.broadcast %cst_23 : f32 to vector<8x256xf32>
    %24 = arith.maximumf %22, %23 : vector<8x256xf32>
    %c0_24 = arith.constant 0 : index
    %c0_25 = arith.constant 0 : index
    %25 = vector.load %arg8[%c0_24, %c0_25] : memref<256x128xf32, #tpu.memory_space<vmem>>, vector<256x128xf32>
    %cst_26 = arith.constant dense<0.000000e+00> : vector<8x128xf32>
    %26 = tpu.matmul %24, %25, %cst_26 {dimension_numbers = #tpu.dot_dimension_numbers<[1], [0], [0], [1], [0, 0, 1, 1], [], []>} : vector<8x256xf32>, vector<256x128xf32>, vector<8x128xf32> -> vector<8x128xf32>
    %27 = vector.broadcast %3 : vector<1x128xf32> to vector<8x128xf32>
    %28 = arith.addf %26, %27 : vector<8x128xf32>
    %cst_27 = arith.constant 0.000000e+00 : f32
    %29 = vector.broadcast %cst_27 : f32 to vector<8x128xf32>
    %30 = arith.maximumf %28, %29 : vector<8x128xf32>
    %c0_28 = arith.constant 0 : index
    %c0_29 = arith.constant 0 : index
    %31 = vector.load %arg10[%c0_28, %c0_29] : memref<128x128xf32, #tpu.memory_space<vmem>>, vector<128x128xf32>
    %cst_30 = arith.constant dense<0.000000e+00> : vector<8x128xf32>
    %32 = tpu.matmul %30, %31, %cst_30 {dimension_numbers = #tpu.dot_dimension_numbers<[1], [0], [0], [1], [0, 0, 1, 1], [], []>} : vector<8x128xf32>, vector<128x128xf32>, vector<8x128xf32> -> vector<8x128xf32>
    %33 = vector.broadcast %4 : vector<1x128xf32> to vector<8x128xf32>
    %34 = arith.addf %32, %33 : vector<8x128xf32>
    %cst_31 = arith.constant 0.000000e+00 : f32
    %35 = vector.broadcast %cst_31 : f32 to vector<8x128xf32>
    %36 = arith.maximumf %34, %35 : vector<8x128xf32>
    %c0_32 = arith.constant 0 : index
    %c0_33 = arith.constant 0 : index
    %37 = vector.load %arg12[%c0_32, %c0_33] : memref<128x128xf32, #tpu.memory_space<vmem>>, vector<128x128xf32>
    %cst_34 = arith.constant dense<0.000000e+00> : vector<8x128xf32>
    %38 = tpu.matmul %36, %37, %cst_34 {dimension_numbers = #tpu.dot_dimension_numbers<[1], [0], [0], [1], [0, 0, 1, 1], [], []>} : vector<8x128xf32>, vector<128x128xf32>, vector<8x128xf32> -> vector<8x128xf32>
    %39 = vector.broadcast %5 : vector<1x128xf32> to vector<8x128xf32>
    %40 = arith.addf %38, %39 : vector<8x128xf32>
    %cst_35 = arith.constant 0.000000e+00 : f32
    %41 = vector.broadcast %cst_35 : f32 to vector<8x128xf32>
    %42 = arith.maximumf %40, %41 : vector<8x128xf32>
    %c0_36 = arith.constant 0 : index
    %c0_37 = arith.constant 0 : index
    %43 = vector.load %arg14[%c0_36, %c0_37] : memref<8x128xf32, #tpu.memory_space<vmem>>, vector<8x128xf32>
    tpu.vector_store %arg14[%c0_36, %c0_37], %42 {strides = array<i32>} : memref<8x128xf32, #tpu.memory_space<vmem>>, vector<8x128xf32>,
    return
  }
  func.func @transform_0(%arg0: i32) -> (i32, i32) {
    %c0_i32 = arith.constant 0 : i32
    %c0_i32_0 = arith.constant 0 : i32
    return %arg0, %c0_i32 : i32, i32
  }
  func.func @transform_1(%arg0: i32) -> (i32, i32) {
    %c0_i32 = arith.constant 0 : i32
    %c0_i32_0 = arith.constant 0 : i32
    %c0_i32_1 = arith.constant 0 : i32
    return %c0_i32, %c0_i32_0 : i32, i32
  }
  func.func @transform_2(%arg0: i32) -> (i32, i32) {
    %c0_i32 = arith.constant 0 : i32
    %c0_i32_0 = arith.constant 0 : i32
    %c0_i32_1 = arith.constant 0 : i32
    return %c0_i32, %c0_i32_0 : i32, i32
  }
  func.func @transform_3(%arg0: i32) -> (i32, i32) {
    %c0_i32 = arith.constant 0 : i32
    %c0_i32_0 = arith.constant 0 : i32
    %c0_i32_1 = arith.constant 0 : i32
    return %c0_i32, %c0_i32_0 : i32, i32
  }
  func.func @transform_4(%arg0: i32) -> (i32, i32) {
    %c0_i32 = arith.constant 0 : i32
    %c0_i32_0 = arith.constant 0 : i32
    %c0_i32_1 = arith.constant 0 : i32
    return %c0_i32, %c0_i32_0 : i32, i32
  }
  func.func @transform_5(%arg0: i32) -> (i32, i32) {
    %c0_i32 = arith.constant 0 : i32
    %c0_i32_0 = arith.constant 0 : i32
    %c0_i32_1 = arith.constant 0 : i32
    return %c0_i32, %c0_i32_0 : i32, i32
  }
  func.func @transform_6(%arg0: i32) -> (i32, i32) {
    %c0_i32 = arith.constant 0 : i32
    %c0_i32_0 = arith.constant 0 : i32
    %c0_i32_1 = arith.constant 0 : i32
    return %c0_i32, %c0_i32_0 : i32, i32
  }
  func.func @transform_7(%arg0: i32) -> (i32, i32) {
    %c0_i32 = arith.constant 0 : i32
    %c0_i32_0 = arith.constant 0 : i32
    %c0_i32_1 = arith.constant 0 : i32
    return %c0_i32, %c0_i32_0 : i32, i32
  }
  func.func @transform_8(%arg0: i32) -> (i32, i32) {
    %c0_i32 = arith.constant 0 : i32
    %c0_i32_0 = arith.constant 0 : i32
    %c0_i32_1 = arith.constant 0 : i32
    return %c0_i32, %c0_i32_0 : i32, i32
  }
  func.func @transform_9(%arg0: i32) -> (i32, i32) {
    %c0_i32 = arith.constant 0 : i32
    %c0_i32_0 = arith.constant 0 : i32
    %c0_i32_1 = arith.constant 0 : i32
    return %c0_i32, %c0_i32_0 : i32, i32
  }
  func.func @transform_10(%arg0: i32) -> (i32, i32) {
    %c0_i32 = arith.constant 0 : i32
    %c0_i32_0 = arith.constant 0 : i32
    %c0_i32_1 = arith.constant 0 : i32
    return %c0_i32, %c0_i32_0 : i32, i32
  }
  func.func @transform_11(%arg0: i32) -> (i32, i32) {
    %c0_i32 = arith.constant 0 : i32
    %c0_i32_0 = arith.constant 0 : i32
    %c0_i32_1 = arith.constant 0 : i32
    return %c0_i32, %c0_i32_0 : i32, i32
  }
  func.func @transform_12(%arg0: i32) -> (i32, i32) {
    %c0_i32 = arith.constant 0 : i32
    %c0_i32_0 = arith.constant 0 : i32
    %c0_i32_1 = arith.constant 0 : i32
    return %c0_i32, %c0_i32_0 : i32, i32
  }
  func.func @transform_13(%arg0: i32) -> (i32, i32) {
    %c0_i32 = arith.constant 0 : i32
    %c0_i32_0 = arith.constant 0 : i32
    return %arg0, %c0_i32 : i32, i32
  }
}

module attributes {stable_mosaic.version = 11 : i64} {
  func.func @kernel(%arg0: i32, %arg1: memref<8x128xf32, #tpu.memory_space<vmem>>, %arg2: memref<128x128xf32, #tpu.memory_space<vmem>>, %arg3: memref<1x128xf32, #tpu.memory_space<vmem>>, %arg4: memref<128x128xf32, #tpu.memory_space<vmem>>, %arg5: memref<1x128xf32, #tpu.memory_space<vmem>>, %arg6: memref<128x256xf32, #tpu.memory_space<vmem>>, %arg7: memref<1x256xf32, #tpu.memory_space<vmem>>, %arg8: memref<256x128xf32, #tpu.memory_space<vmem>>, %arg9: memref<1x128xf32, #tpu.memory_space<vmem>>, %arg10: memref<128x128xf32, #tpu.memory_space<vmem>>, %arg11: memref<1x128xf32, #tpu.memory_space<vmem>>, %arg12: memref<128x128xf32, #tpu.memory_space<vmem>>, %arg13: memref<1x128xf32, #tpu.memory_space<vmem>>, %arg14: memref<8x128xf32, #tpu.memory_space<vmem>>) attributes {dimension_semantics = [#tpu.dimension_semantics<parallel>], iteration_bounds = array<i64: 1>, scalar_prefetch = 0 : i64, scratch_operands = 0 : i64, tpu.core_type = #tpu.core_type<tc>, window_params = [{transform_indices = @transform_0, window_bounds = array<i64: 8, 128>}, {pipeline_mode = #tpu.pipeline_mode<synchronous>, transform_indices = @transform_1, window_bounds = array<i64: 128, 128>}, {pipeline_mode = #tpu.pipeline_mode<synchronous>, transform_indices = @transform_2, window_bounds = array<i64: 1, 128>}, {pipeline_mode = #tpu.pipeline_mode<synchronous>, transform_indices = @transform_3, window_bounds = array<i64: 128, 128>}, {pipeline_mode = #tpu.pipeline_mode<synchronous>, transform_indices = @transform_4, window_bounds = array<i64: 1, 128>}, {pipeline_mode = #tpu.pipeline_mode<synchronous>, transform_indices = @transform_5, window_bounds = array<i64: 128, 256>}, {pipeline_mode = #tpu.pipeline_mode<synchronous>, transform_indices = @transform_6, window_bounds = array<i64: 1, 256>}, {pipeline_mode = #tpu.pipeline_mode<synchronous>, transform_indices = @transform_7, window_bounds = array<i64: 256, 128>}, {pipeline_mode = #tpu.pipeline_mode<synchronous>, transform_indices = @transform_8, window_bounds = array<i64: 1, 128>}, {pipeline_mode = #tpu.pipeline_mode<synchronous>, transform_indices = @transform_9, window_bounds = array<i64: 128, 128>}, {pipeline_mode = #tpu.pipeline_mode<synchronous>, transform_indices = @transform_10, window_bounds = array<i64: 1, 128>}, {pipeline_mode = #tpu.pipeline_mode<synchronous>, transform_indices = @transform_11, window_bounds = array<i64: 128, 128>}, {pipeline_mode = #tpu.pipeline_mode<synchronous>, transform_indices = @transform_12, window_bounds = array<i64: 1, 128>}, {transform_indices = @transform_13, window_bounds = array<i64: 8, 128>}]} {
    %c0 = arith.constant 0 : index
    %c0_0 = arith.constant 0 : index
    %0 = vector.load %arg3[%c0, %c0_0] : memref<1x128xf32, #tpu.memory_space<vmem>>, vector<1x128xf32>
    %c0_1 = arith.constant 0 : index
    %c0_2 = arith.constant 0 : index
    %1 = vector.load %arg5[%c0_1, %c0_2] : memref<1x128xf32, #tpu.memory_space<vmem>>, vector<1x128xf32>
    %c0_3 = arith.constant 0 : index
    %c0_4 = arith.constant 0 : index
    %2 = vector.load %arg7[%c0_3, %c0_4] : memref<1x256xf32, #tpu.memory_space<vmem>>, vector<1x256xf32>
    %c0_5 = arith.constant 0 : index
    %c0_6 = arith.constant 0 : index
    %3 = vector.load %arg9[%c0_5, %c0_6] : memref<1x128xf32, #tpu.memory_space<vmem>>, vector<1x128xf32>
    %c0_7 = arith.constant 0 : index
    %c0_8 = arith.constant 0 : index
    %4 = vector.load %arg11[%c0_7, %c0_8] : memref<1x128xf32, #tpu.memory_space<vmem>>, vector<1x128xf32>
    %c0_9 = arith.constant 0 : index
    %c0_10 = arith.constant 0 : index
    %5 = vector.load %arg13[%c0_9, %c0_10] : memref<1x128xf32, #tpu.memory_space<vmem>>, vector<1x128xf32>
    %c0_11 = arith.constant 0 : index
    %c0_12 = arith.constant 0 : index
    %6 = vector.load %arg1[%c0_11, %c0_12] : memref<8x128xf32, #tpu.memory_space<vmem>>, vector<8x128xf32>
    %c0_13 = arith.constant 0 : index
    %c0_14 = arith.constant 0 : index
    %7 = vector.load %arg2[%c0_13, %c0_14] : memref<128x128xf32, #tpu.memory_space<vmem>>, vector<128x128xf32>
    %cst = arith.constant dense<0.000000e+00> : vector<8x128xf32>
    %8 = tpu.matmul %6, %7, %cst {dimension_numbers = #tpu.dot_dimension_numbers<[1], [0], [0], [1], [0, 0, 1, 1], [], []>} : vector<8x128xf32>, vector<128x128xf32>, vector<8x128xf32> -> vector<8x128xf32>
    %9 = vector.broadcast %0 : vector<1x128xf32> to vector<8x128xf32>
    %10 = arith.addf %8, %9 : vector<8x128xf32>
    %cst_15 = arith.constant 0.000000e+00 : f32
    %11 = vector.broadcast %cst_15 : f32 to vector<8x128xf32>
    %12 = arith.maximumf %10, %11 : vector<8x128xf32>
    %c0_16 = arith.constant 0 : index
    %c0_17 = arith.constant 0 : index
    %13 = vector.load %arg4[%c0_16, %c0_17] : memref<128x128xf32, #tpu.memory_space<vmem>>, vector<128x128xf32>
    %cst_18 = arith.constant dense<0.000000e+00> : vector<8x128xf32>
    %14 = tpu.matmul %12, %13, %cst_18 {dimension_numbers = #tpu.dot_dimension_numbers<[1], [0], [0], [1], [0, 0, 1, 1], [], []>} : vector<8x128xf32>, vector<128x128xf32>, vector<8x128xf32> -> vector<8x128xf32>
    %15 = vector.broadcast %1 : vector<1x128xf32> to vector<8x128xf32>
    %16 = arith.addf %14, %15 : vector<8x128xf32>
    %cst_19 = arith.constant 0.000000e+00 : f32
    %17 = vector.broadcast %cst_19 : f32 to vector<8x128xf32>
    %18 = arith.maximumf %16, %17 : vector<8x128xf32>
    %c0_20 = arith.constant 0 : index
    %c0_21 = arith.constant 0 : index
    %19 = vector.load %arg6[%c0_20, %c0_21] : memref<128x256xf32, #tpu.memory_space<vmem>>, vector<128x256xf32>
    %cst_22 = arith.constant dense<0.000000e+00> : vector<8x256xf32>
    %20 = tpu.matmul %18, %19, %cst_22 {dimension_numbers = #tpu.dot_dimension_numbers<[1], [0], [0], [1], [0, 0, 1, 1], [], []>} : vector<8x128xf32>, vector<128x256xf32>, vector<8x256xf32> -> vector<8x256xf32>
    %21 = vector.broadcast %2 : vector<1x256xf32> to vector<8x256xf32>
    %22 = arith.addf %20, %21 : vector<8x256xf32>
    %cst_23 = arith.constant 0.000000e+00 : f32
    %23 = vector.broadcast %cst_23 : f32 to vector<8x256xf32>
    %24 = arith.maximumf %22, %23 : vector<8x256xf32>
    %c0_24 = arith.constant 0 : index
    %c0_25 = arith.constant 0 : index
    %25 = vector.load %arg8[%c0_24, %c0_25] : memref<256x128xf32, #tpu.memory_space<vmem>>, vector<256x128xf32>
    %cst_26 = arith.constant dense<0.000000e+00> : vector<8x128xf32>
    %26 = tpu.matmul %24, %25, %cst_26 {dimension_numbers = #tpu.dot_dimension_numbers<[1], [0], [0], [1], [0, 0, 1, 1], [], []>} : vector<8x256xf32>, vector<256x128xf32>, vector<8x128xf32> -> vector<8x128xf32>
    %27 = vector.broadcast %3 : vector<1x128xf32> to vector<8x128xf32>
    %28 = arith.addf %26, %27 : vector<8x128xf32>
    %cst_27 = arith.constant 0.000000e+00 : f32
    %29 = vector.broadcast %cst_27 : f32 to vector<8x128xf32>
    %30 = arith.maximumf %28, %29 : vector<8x128xf32>
    %c0_28 = arith.constant 0 : index
    %c0_29 = arith.constant 0 : index
    %31 = vector.load %arg10[%c0_28, %c0_29] : memref<128x128xf32, #tpu.memory_space<vmem>>, vector<128x128xf32>
    %cst_30 = arith.constant dense<0.000000e+00> : vector<8x128xf32>
    %32 = tpu.matmul %30, %31, %cst_30 {dimension_numbers = #tpu.dot_dimension_numbers<[1], [0], [0], [1], [0, 0, 1, 1], [], []>} : vector<8x128xf32>, vector<128x128xf32>, vector<8x128xf32> -> vector<8x128xf32>
    %33 = vector.broadcast %4 : vector<1x128xf32> to vector<8x128xf32>
    %34 = arith.addf %32, %33 : vector<8x128xf32>
    %cst_31 = arith.constant 0.000000e+00 : f32
    %35 = vector.broadcast %cst_31 : f32 to vector<8x128xf32>
    %36 = arith.maximumf %34, %35 : vector<8x128xf32>
    %c0_32 = arith.constant 0 : index
    %c0_33 = arith.constant 0 : index
    %37 = vector.load %arg12[%c0_32, %c0_33] : memref<128x128xf32, #tpu.memory_space<vmem>>, vector<128x128xf32>
    %cst_34 = arith.constant dense<0.000000e+00> : vector<8x128xf32>
    %38 = tpu.matmul %36, %37, %cst_34 {dimension_numbers = #tpu.dot_dimension_numbers<[1], [0], [0], [1], [0, 0, 1, 1], [], []>} : vector<8x128xf32>, vector<128x128xf32>, vector<8x128xf32> -> vector<8x128xf32>
    %39 = vector.broadcast %5 : vector<1x128xf32> to vector<8x128xf32>
    %40 = arith.addf %38, %39 : vector<8x128xf32>
    %cst_35 = arith.constant 0.000000e+00 : f32
    %41 = vector.broadcast %cst_35 : f32 to vector<8x128xf32>
    %42 = arith.maximumf %40, %41 : vector<8x128xf32>
    %c0_36 = arith.constant 0 : index
    %c0_37 = arith.constant 0 : index
    %43 = vector.load %arg14[%c0_36, %c0_37] : memref<8x128xf32, #tpu.memory_space<vmem>>, vector<8x128xf32>
    tpu.vector_store %arg14[%c0_36, %c0_37], %42 {strides = array<i32>} : memref<8x128xf32, #tpu.memory_space<vmem>>, vector<8x128xf32>,
    return
  }
  func.func @transform_0(%arg0: i32) -> (i32, i32) {
    %c0_i32 = arith.constant 0 : i32
    %c0_i32_0 = arith.constant 0 : i32
    return %arg0, %c0_i32 : i32, i32
  }
  func.func @transform_1(%arg0: i32) -> (i32, i32) {
    %c0_i32 = arith.constant 0 : i32
    %c0_i32_0 = arith.constant 0 : i32
    %c0_i32_1 = arith.constant 0 : i32
    return %c0_i32, %c0_i32_0 : i32, i32
  }
  func.func @transform_2(%arg0: i32) -> (i32, i32) {
    %c0_i32 = arith.constant 0 : i32
    %c0_i32_0 = arith.constant 0 : i32
    %c0_i32_1 = arith.constant 0 : i32
    return %c0_i32, %c0_i32_0 : i32, i32
  }
  func.func @transform_3(%arg0: i32) -> (i32, i32) {
    %c0_i32 = arith.constant 0 : i32
    %c0_i32_0 = arith.constant 0 : i32
    %c0_i32_1 = arith.constant 0 : i32
    return %c0_i32, %c0_i32_0 : i32, i32
  }
  func.func @transform_4(%arg0: i32) -> (i32, i32) {
    %c0_i32 = arith.constant 0 : i32
    %c0_i32_0 = arith.constant 0 : i32
    %c0_i32_1 = arith.constant 0 : i32
    return %c0_i32, %c0_i32_0 : i32, i32
  }
  func.func @transform_5(%arg0: i32) -> (i32, i32) {
    %c0_i32 = arith.constant 0 : i32
    %c0_i32_0 = arith.constant 0 : i32
    %c0_i32_1 = arith.constant 0 : i32
    return %c0_i32, %c0_i32_0 : i32, i32
  }
  func.func @transform_6(%arg0: i32) -> (i32, i32) {
    %c0_i32 = arith.constant 0 : i32
    %c0_i32_0 = arith.constant 0 : i32
    %c0_i32_1 = arith.constant 0 : i32
    return %c0_i32, %c0_i32_0 : i32, i32
  }
  func.func @transform_7(%arg0: i32) -> (i32, i32) {
    %c0_i32 = arith.constant 0 : i32
    %c0_i32_0 = arith.constant 0 : i32
    %c0_i32_1 = arith.constant 0 : i32
    return %c0_i32, %c0_i32_0 : i32, i32
  }
  func.func @transform_8(%arg0: i32) -> (i32, i32) {
    %c0_i32 = arith.constant 0 : i32
    %c0_i32_0 = arith.constant 0 : i32
    %c0_i32_1 = arith.constant 0 : i32
    return %c0_i32, %c0_i32_0 : i32, i32
  }
  func.func @transform_9(%arg0: i32) -> (i32, i32) {
    %c0_i32 = arith.constant 0 : i32
    %c0_i32_0 = arith.constant 0 : i32
    %c0_i32_1 = arith.constant 0 : i32
    return %c0_i32, %c0_i32_0 : i32, i32
  }
  func.func @transform_10(%arg0: i32) -> (i32, i32) {
    %c0_i32 = arith.constant 0 : i32
    %c0_i32_0 = arith.constant 0 : i32
    %c0_i32_1 = arith.constant 0 : i32
    return %c0_i32, %c0_i32_0 : i32, i32
  }
  func.func @transform_11(%arg0: i32) -> (i32, i32) {
    %c0_i32 = arith.constant 0 : i32
    %c0_i32_0 = arith.constant 0 : i32
    %c0_i32_1 = arith.constant 0 : i32
    return %c0_i32, %c0_i32_0 : i32, i32
  }
  func.func @transform_12(%arg0: i32) -> (i32, i32) {
    %c0_i32 = arith.constant 0 : i32
    %c0_i32_0 = arith.constant 0 : i32
    %c0_i32_1 = arith.constant 0 : i32
    return %c0_i32, %c0_i32_0 : i32, i32
  }
  func.func @transform_13(%arg0: i32) -> (i32, i32) {
    %c0_i32 = arith.constant 0 : i32
    %c0_i32_0 = arith.constant 0 : i32
    return %arg0, %c0_i32 : i32, i32
  }
}

</mosaic_0001>

<bundles_post_ra>
// kernel: _mlp_forward_impl.1
= control target key start
LH: loop header
LB: loop body
LE: loop exit
PB: predicated region body
PF: predicated region fallthrough
CT: control target
= control target key end

     0   :  { %18 = vsyncpa [#allocation3], 0  ;;  %s1602_s0 = inlined_call_operand.vmem [shape: f32[8,128], index: 0, kind: input, shape index: {}]   ;;  %s1603_s1 = inlined_call_operand.hbm [shape: f32[128,128], index: 1, kind: input, shape index: {}]   ;;  %s1604_s2 = inlined_call_operand.vmem [shape: f32[1,128], index: 2, kind: input, shape index: {}]   ;;  %s1605_s3 = inlined_call_operand.hbm [shape: f32[128,128], index: 3, kind: input, shape index: {}]   ;;  %s1606_s4 = inlined_call_operand.vmem [shape: f32[1,128], index: 4, kind: input, shape index: {}]   ;;  %s1607_s5 = inlined_call_operand.hbm [shape: f32[128,256], index: 5, kind: input, shape index: {}]   ;;  %s1608_s6 = inlined_call_operand.vmem [shape: f32[1,256], index: 6, kind: input, shape index: {}]   ;;  %s1609_s7 = inlined_call_operand.hbm [shape: f32[256,128], index: 7, kind: input, shape index: {}]   ;;  %s1610_s8 = inlined_call_operand.vmem [shape: f32[1,128], index: 8, kind: input, shape index: {}]   ;;  %s1611_s9 = inlined_call_operand.hbm [shape: f32[128,128], index: 9, kind: input, shape index: {}]   ;;  %s1612_s10 = inlined_call_operand.vmem [shape: f32[1,128], index: 10, kind: input, shape index: {}]   ;;  %s1613_s11 = inlined_call_operand.hbm [shape: f32[128,128], index: 11, kind: input, shape index: {}]   ;;  %s1614_s12 = inlined_call_operand.vmem [shape: f32[1,128], index: 12, kind: input, shape index: {}]   ;;  %s1615_s13 = inlined_call_operand.hbm [shape: f32[8,128], index: 13, kind: output, shape index: {}]  }
   0x1   :  { %19 = vsyncpa [#allocation6], 0 }
   0x2   :  { %20 = vsyncpa [#allocation9], 0 }
   0x3   :  { %21 = vsyncpa [#allocation12], 0 }
   0x4   :  { %22 = vsyncpa [#allocation4], 0  ;;  %s1336_s25 = smov [#allocation5]   ;;  %s1337_s27 = smov [#allocation8]  }
   0x5   :  { %s44_s26 = sshll.u32 %s1336_s25, 4  ;;  %s72_s28 = sshll.u32 %s1337_s27, 4  ;;  %s45_s26 = int_to_ptr.vmem [resolvable:$true] %s44_s26  ;;  %s1420_s28 = int_to_ptr.vmem [resolvable:$true] %s72_s28 }
   0x6   :  { %s1172_s14 = scalar_lea.hbm %s1605_s3, 2048 }
   0x7   :  { %p1173_p0 = scmp.ne.s32.totalorder %s1605_s3, %s1172_s14  ;;  %p1176_p1 = scmp.lt.u32.totalorder %s1172_s14, %s1605_s3 }
   0x9   :  { %p1178_p2 = pnand %p1176_p1, %p1173_p0 }
   0xb   :  { %1181 = shalt.err (!%p1178_p2)
}
   0xc   :  { %s1182_s19 = scalar_lea.vmem %s45_s26, 2048  ;;  %p1187_p4 = scmp.lt.s32.totalorder %s45_s26, %s45_s26 }
   0xd   :  { %p1183_p3 = scmp.ne.s32.totalorder %s45_s26, %s1182_s19  ;;  %p1188_p5 = scmp.lt.s32.totalorder %s1182_s19, %s1182_s19 }
   0xf   :  { %p1189_p6 = por %p1188_p5, %p1187_p4 }
  0x11   :  { %p1190_p7 = pnand %p1189_p6, %p1183_p3 }
  0x13   :  { %1193 = shalt.err (!%p1190_p7)
}
  0x14   :  { %s1338_s20 = smov 128   ;;  %s1339_s21 = smov 8  }
  0x15   :  { %50 = dma.hbm_to_vmem [thread:$0]  %s1605_s3, 2048, %s45_s26, [#allocation6], %s1338_s20, %s1338_s20, %s1339_s21  }
  0x16   :  { %s1194_s27 = scalar_lea.hbm %s1609_s7, 4096 }
  0x17   :  { %p1195_p8 = scmp.ne.s32.totalorder %s1609_s7, %s1194_s27  ;;  %p1198_p9 = scmp.lt.u32.totalorder %s1194_s27, %s1609_s7 }
  0x19   :  { %p1200_p10 = pnand %p1198_p9, %p1195_p8 }
  0x1b   :  { %1203 = shalt.err (!%p1200_p10)
}
  0x1c   :  { %s1204_s16 = scalar_lea.vmem %s1420_s28, 4096  ;;  %p1209_p12 = scmp.lt.s32.totalorder %s1420_s28, %s1420_s28 }
  0x1d   :  { %p1205_p11 = scmp.ne.s32.totalorder %s1420_s28, %s1204_s16  ;;  %p1210_p13 = scmp.lt.s32.totalorder %s1204_s16, %s1204_s16 }
  0x1f   :  { %p1211_p0 = por %p1210_p13, %p1209_p12 }
  0x21   :  { %p1212_p1 = pnand %p1211_p0, %p1205_p11 }
  0x23   :  { %1215 = shalt.err (!%p1212_p1)
}
  0x24   :  { %78 = dma.hbm_to_vmem [thread:$0]  %s1609_s7, 4096, %s1420_s28, [#allocation9], %s1338_s20, %s1338_s20, %s1339_s21  }
  0x25   :  { %s1340_s17 = smov [#allocation2]   ;;  %s1341_s19 = smov [#allocation7]  }
  0x26   :  { %s30_s18 = sshll.u32 %s1340_s17, 4  ;;  %s58_s22 = sshll.u32 %s1341_s19, 4  ;;  %s31_s18 = int_to_ptr.vmem [resolvable:$true] %s30_s18  ;;  %s1457_s22 = int_to_ptr.vmem [resolvable:$true] %s58_s22 }
  0x27   :  { %s1216_s25 = scalar_lea.hbm %s1603_s1, 2048 }
  0x28   :  { %p1217_p2 = scmp.ne.s32.totalorder %s1603_s1, %s1216_s25  ;;  %p1220_p3 = scmp.lt.u32.totalorder %s1216_s25, %s1603_s1 }
  0x2a   :  { %p1222_p4 = pnand %p1220_p3, %p1217_p2 }
  0x2c   :  { %1225 = shalt.err (!%p1222_p4)
}
  0x2d   :  { %s1226_s7 = scalar_lea.vmem %s31_s18, 2048  ;;  %p1231_p6 = scmp.lt.s32.totalorder %s31_s18, %s31_s18 }
  0x2e   :  { %p1227_p5 = scmp.ne.s32.totalorder %s31_s18, %s1226_s7  ;;  %p1232_p7 = scmp.lt.s32.totalorder %s1226_s7, %s1226_s7 }
  0x30   :  { %p1233_p8 = por %p1232_p7, %p1231_p6 }
  0x32   :  { %p1234_p9 = pnand %p1233_p8, %p1227_p5 }
  0x34   :  { %1237 = shalt.err (!%p1234_p9)
}
  0x35   :  { %36 = dma.hbm_to_vmem [thread:$0]  %s1603_s1, 2048, %s31_s18, [#allocation3], %s1338_s20, %s1338_s20, %s1339_s21  }
  0x36   :  { %s1238_s26 = scalar_lea.hbm %s1607_s5, 4096 }
  0x37   :  { %p1239_p10 = scmp.ne.s32.totalorder %s1607_s5, %s1238_s26  ;;  %p1242_p11 = scmp.lt.u32.totalorder %s1238_s26, %s1607_s5 }
  0x39   :  { %p1244_p12 = pnand %p1242_p11, %p1239_p10 }
  0x3b   :  { %1247 = shalt.err (!%p1244_p12)
}
  0x3c   :  { %s1248_s25 = scalar_lea.vmem %s1457_s22, 4096  ;;  %p1253_p0 = scmp.lt.s32.totalorder %s1457_s22, %s1457_s22 }
  0x3d   :  { %p1249_p13 = scmp.ne.s32.totalorder %s1457_s22, %s1248_s25  ;;  %p1254_p1 = scmp.lt.s32.totalorder %s1248_s25, %s1248_s25 }
  0x3f   :  { %p1255_p2 = por %p1254_p1, %p1253_p0 }
  0x41   :  { %p1256_p3 = pnand %p1255_p2, %p1249_p13 }
  0x43   :  { %1259 = shalt.err (!%p1256_p3)
}
  0x44   :  { %s1342_s1 = smov 256   ;;  %s1343_s18 = smov 16  }
  0x45   :  { %64 = dma.hbm_to_vmem [thread:$0]  %s1607_s5, 4096, %s1457_s22, [#allocation6], %s1342_s1, %s1342_s1, %s1343_s18  }
  0x46   :  { %s1344_s30 = smov [#allocation10]   ;;  %s1345_s7 = smov [#allocation11]  }
  0x47   :  { %s86_s14 = sshll.u32 %s1344_s30, 4  ;;  %s100_s28 = sshll.u32 %s1345_s7, 4  ;;  %s87_s14 = int_to_ptr.vmem [resolvable:$true] %s86_s14  ;;  %s1491_s28 = int_to_ptr.vmem [resolvable:$true] %s100_s28 }
  0x48   :  { %s1260_s3 = scalar_lea.hbm %s1611_s9, 2048 }
  0x49   :  { %p1261_p4 = scmp.ne.s32.totalorder %s1611_s9, %s1260_s3  ;;  %p1264_p5 = scmp.lt.u32.totalorder %s1260_s3, %s1611_s9 }
  0x4b   :  { %p1266_p6 = pnand %p1264_p5, %p1261_p4 }
  0x4d   :  { %1269 = shalt.err (!%p1266_p6)
}
  0x4e   :  { %s1270_s5 = scalar_lea.vmem %s87_s14, 2048  ;;  %p1275_p8 = scmp.lt.s32.totalorder %s87_s14, %s87_s14 }
  0x4f   :  { %p1271_p7 = scmp.ne.s32.totalorder %s87_s14, %s1270_s5  ;;  %p1276_p9 = scmp.lt.s32.totalorder %s1270_s5, %s1270_s5 }
  0x51   :  { %p1277_p10 = por %p1276_p9, %p1275_p8 }
  0x53   :  { %p1278_p11 = pnand %p1277_p10, %p1271_p7 }
  0x55   :  { %1281 = shalt.err (!%p1278_p11)
}
  0x56   :  { %92 = dma.hbm_to_vmem [thread:$0]  %s1611_s9, 2048, %s87_s14, [#allocation9], %s1338_s20, %s1338_s20, %s1339_s21  }
  0x57   :  { %s1282_s18 = scalar_lea.hbm %s1613_s11, 2048 }
  0x58   :  { %p1283_p12 = scmp.ne.s32.totalorder %s1613_s11, %s1282_s18  ;;  %p1286_p13 = scmp.lt.u32.totalorder %s1282_s18, %s1613_s11 }
  0x5a   :  { %p1288_p0 = pnand %p1286_p13, %p1283_p12 }
  0x5c   :  { %1291 = shalt.err (!%p1288_p0)
}
  0x5d   :  { %s1292_s15 = scalar_lea.vmem %s1491_s28, 2048  ;;  %p1297_p2 = scmp.lt.s32.totalorder %s1491_s28, %s1491_s28 }
  0x5e   :  { %p1293_p1 = scmp.ne.s32.totalorder %s1491_s28, %s1292_s15  ;;  %p1298_p3 = scmp.lt.s32.totalorder %s1292_s15, %s1292_s15 }
  0x60   :  { %p1299_p4 = por %p1298_p3, %p1297_p2 }
  0x62   :  { %p1300_p5 = pnand %p1299_p4, %p1293_p1 }
  0x64   :  { %1303 = shalt.err (!%p1300_p5)
}
  0x65   :  { %106 = dma.hbm_to_vmem [thread:$0]  %s1613_s11, 2048, %s1491_s28, [#allocation12], %s1338_s20, %s1338_s20, %s1339_s21  }
  0x66   :  { %1326 = dma.done.wait [#allocation3], 2048  }
  0x67   :  { %1327 = vsyncadd [#allocation3], 4294965248 }
  0x68   :  { %1328 = dma.done.wait [#allocation6], 6144  }
  0x69   :  { %1329 = vsyncadd [#allocation6], 4294961152 }
  0x6a   :  { %1330 = dma.done.wait [#allocation9], 6144  }
  0x6b   :  { %1331 = vsyncadd [#allocation9], 4294961152 }
  0x6c   :  { %1332 = dma.done.wait [#allocation12], 2048  }
  0x6d   :  { %1333 = vsyncadd [#allocation12], 4294965248  ;;  %v1346_v0 = vmov 0.0|0.0   ;;  %vm1347_vm0 = vmmov 0   ;;  %v1348_v1 = vmov 0.0   ;;  %v134_v2 = vld [vmem:[#allocation2] sm:$0xff] }
  0x6e   :  { %998 = vmatprep.subr.bf16.mxu0 %v1346_v0  ;;  %890 = vmatprep.mubr.msk.f32.mxu0 %vm1347_vm0, %v1348_v1  ;;  %v135_v3 = vld [vmem:[#allocation2 + $0x8] sm:$0xff]  ;;  %v136_v4 = vld [vmem:[#allocation2 + $0x10] sm:$0xff]  ;;  %v137_v6 = vld [vmem:[#allocation2 + $0x18] sm:$0xff]  ;;  %s1349_s23 = smov [#allocation13]  }
  0x6f   :  { %1022 = vmatprep.subr.bf16.mxu1 %v1346_v0  ;;  %925 = vmatprep.mubr.msk.f32.mxu1 %vm1347_vm0, %v1348_v1  ;;  %v999_v5 = vpack.c.bf16 %v135_v3, %v134_v2  ;;  %v1002_v7 = vpack.c.bf16 %v137_v6, %v136_v4  ;;  %v138_v8 = vld [vmem:[#allocation2 + $0x20] sm:$0xff]  ;;  %v139_v9 = vld [vmem:[#allocation2 + $0x28] sm:$0xff]  ;;  %v229_v12 = vld [vmem:[#allocation5 + $0x10] sm:$0xff]  ;;  %s738_s5 = sshll.u32 %s1349_s23, 4  ;;  %s739_s5 = int_to_ptr.vmem [resolvable:$true] %s738_s5 }
  0x70   :  { %v227_v10 = vld [vmem:[#allocation5] sm:$0xff]  ;;  %v228_v11 = vld [vmem:[#allocation5 + $0x8] sm:$0xff]  ;;  %v230_v13 = vld [vmem:[#allocation5 + $0x18] sm:$0xff]  ;;  %v1005_v14 = vpack.c.bf16 %v139_v9, %v138_v8  ;;  %s1304_s22 = scalar_lea.vmem %s739_s5, 128  ;;  %p1309_p7 = scmp.lt.s32.totalorder %s739_s5, %s739_s5 }
  0x71   :  { %1000 = vmatpush3.bf16.msra.mxu0 %v999_v5  ;;  %v1023_v15 = vpack.c.bf16 %v228_v11, %v227_v10  ;;  %v140_v16 = vld [vmem:[#allocation2 + $0x30] sm:$0xff]  ;;  %v141_v17 = vld [vmem:[#allocation2 + $0x38] sm:$0xff]  ;;  %v1026_v18 = vpack.c.bf16 %v230_v13, %v229_v12  ;;  %v231_v19 = vld [vmem:[#allocation5 + $0x20] sm:$0xff]  ;;  %p1305_p6 = scmp.ne.s32.totalorder %s739_s5, %s1304_s22  ;;  %p1310_p8 = scmp.lt.s32.totalorder %s1304_s22, %s1304_s22 }
  0x72   :  { %1001 = vmatprep.subr.bf16.mxu0 %v1346_v0  ;;  %v232_v20 = vld [vmem:[#allocation5 + $0x28] sm:$0xff]  ;;  %v1008_v21 = vpack.c.bf16 %v141_v17, %v140_v16  ;;  %v142_v22 = vld [vmem:[#allocation2 + $0x40] sm:$0xff]  ;;  %v233_v25 = vld [vmem:[#allocation5 + $0x30] sm:$0xff] }
  0x73   :  { %1024 = vmatpush3.bf16.msra.mxu1 %v1023_v15  ;;  %v143_v23 = vld [vmem:[#allocation2 + $0x48] sm:$0xff]  ;;  %v1029_v24 = vpack.c.bf16 %v232_v20, %v231_v19  ;;  %v234_v26 = vld [vmem:[#allocation5 + $0x38] sm:$0xff]  ;;  %v144_v28 = vld [vmem:[#allocation2 + $0x50] sm:$0xff]  ;;  %p1311_p9 = por %p1310_p8, %p1309_p7 }
  0x74   :  { %1025 = vmatprep.subr.bf16.mxu1 %v1346_v0  ;;  %v1011_v27 = vpack.c.bf16 %v143_v23, %v142_v22  ;;  %v145_v29 = vld [vmem:[#allocation2 + $0x58] sm:$0xff]  ;;  %v1032_v30 = vpack.c.bf16 %v234_v26, %v233_v25  ;;  %v235_v31 = vld [vmem:[#allocation5 + $0x40] sm:$0xff]  ;;  %v236_v32 = vld [vmem:[#allocation5 + $0x48] sm:$0xff] }
  0x75   :  { %1003 = vmatpush3.bf16.msra.mxu0 %v1002_v7  ;;  %v1014_v33 = vpack.c.bf16 %v145_v29, %v144_v28  ;;  %v146_v34 = vld [vmem:[#allocation2 + $0x60] sm:$0xff]  ;;  %v147_v35 = vld [vmem:[#allocation2 + $0x68] sm:$0xff]  ;;  %v1035_v36 = vpack.c.bf16 %v236_v32, %v235_v31  ;;  %v237_v37 = vld [vmem:[#allocation5 + $0x50] sm:$0xff]  ;;  %p1312_p10 = pnand %p1311_p9, %p1305_p6 }
  0x76   :  { %1004 = vmatprep.subr.bf16.mxu0 %v1346_v0  ;;  %v238_v38 = vld [vmem:[#allocation5 + $0x58] sm:$0xff]  ;;  %v1017_v39 = vpack.c.bf16 %v147_v35, %v146_v34  ;;  %v148_v40 = vld [vmem:[#allocation2 + $0x70] sm:$0xff]  ;;  %v239_v43 = vld [vmem:[#allocation5 + $0x60] sm:$0xff] }
  0x77   :  { %1027 = vmatpush3.bf16.msra.mxu1 %v1026_v18  ;;  %v149_v41 = vld [vmem:[#allocation2 + $0x78] sm:$0xff]  ;;  %v1038_v42 = vpack.c.bf16 %v238_v38, %v237_v37  ;;  %v240_v44 = vld [vmem:[#allocation5 + $0x68] sm:$0xff]  ;;  %v133_v47 = vld [vmem:[%s1602_s0] sm:$0xff] }
  0x78   :  { %1028 = vmatprep.subr.bf16.mxu1 %v1346_v0  ;;  %v1020_v45 = vpack.c.bf16 %v149_v41, %v148_v40  ;;  %v1041_v46 = vpack.c.bf16 %v240_v44, %v239_v43  ;;  %v241_v48 = vld [vmem:[#allocation5 + $0x70] sm:$0xff]  ;;  %v242_v49 = vld [vmem:[#allocation5 + $0x78] sm:$0xff]  ;;  %v321_v51 = vld [vmem:[#allocation7 + $0x8] sm:$0xff] }
  0x79   :  { %1006 = vmatpush3.bf16.msra.mxu0 %v1005_v14  ;;  %v1044_v50 = vpack.c.bf16 %v242_v49, %v241_v48  ;;  %v323_v52 = vld [vmem:[#allocation7 + $0x18] sm:$0xff]  ;;  %v320_v53 = vld [vmem:[#allocation7] sm:$0xff]  ;;  %v322_v55 = vld [vmem:[#allocation7 + $0x10] sm:$0xff] }
  0x7a   :  { %1007 = vmatprep.subr.bf16.mxu0 %v1346_v0  ;;  %v1046_v54 = vpack.c.bf16 %v323_v52, %v321_v51  ;;  %v325_v56 = vld [vmem:[#allocation7 + $0x28] sm:$0xff]  ;;  %v327_v57 = vld [vmem:[#allocation7 + $0x38] sm:$0xff]  ;;  %v1048_v58 = vpack.c.bf16 %v322_v55, %v320_v53  ;;  %v324_v60 = vld [vmem:[#allocation7 + $0x20] sm:$0xff] }
  0x7b   :  { %1030 = vmatpush3.bf16.msra.mxu1 %v1029_v24  ;;  %v1050_v59 = vpack.c.bf16 %v327_v57, %v325_v56  ;;  %v326_v61 = vld [vmem:[#allocation7 + $0x30] sm:$0xff]  ;;  %v329_v62 = vld [vmem:[#allocation7 + $0x48] sm:$0xff]  ;;  %v331_v63 = vld [vmem:[#allocation7 + $0x58] sm:$0xff] }
  0x7c   :  { %1031 = vmatprep.subr.bf16.mxu1 %v1346_v0  ;;  %v1052_v2 = vpack.c.bf16 %v326_v61, %v324_v60  ;;  %v1054_v3 = vpack.c.bf16 %v331_v63, %v329_v62  ;;  %v328_v4 = vld [vmem:[#allocation7 + $0x40] sm:$0xff]  ;;  %v330_v5 = vld [vmem:[#allocation7 + $0x50] sm:$0xff]  ;;  %v333_v6 = vld [vmem:[#allocation7 + $0x68] sm:$0xff] }
  0x7d   :  { %1009 = vmatpush3.bf16.msra.mxu0 %v1008_v21  ;;  %v335_v7 = vld [vmem:[#allocation7 + $0x78] sm:$0xff]  ;;  %v1056_v8 = vpack.c.bf16 %v330_v5, %v328_v4  ;;  %v332_v10 = vld [vmem:[#allocation7 + $0x60] sm:$0xff]  ;;  %v334_v11 = vld [vmem:[#allocation7 + $0x70] sm:$0xff] }
  0x7e   :  { %1010 = vmatprep.subr.bf16.mxu0 %v1346_v0  ;;  %v1058_v9 = vpack.c.bf16 %v335_v7, %v333_v6  ;;  %v337_v12 = vld [vmem:[#allocation7 + $0x88] sm:$0xff]  ;;  %v339_v13 = vld [vmem:[#allocation7 + $0x98] sm:$0xff]  ;;  %v1060_v14 = vpack.c.bf16 %v334_v11, %v332_v10  ;;  %v336_v16 = vld [vmem:[#allocation7 + $0x80] sm:$0xff] }
  0x7f   :  { %1033 = vmatpush3.bf16.msra.mxu1 %v1032_v30  ;;  %v1062_v15 = vpack.c.bf16 %v339_v13, %v337_v12  ;;  %v338_v17 = vld [vmem:[#allocation7 + $0x90] sm:$0xff]  ;;  %v341_v18 = vld [vmem:[#allocation7 + $0xa8] sm:$0xff]  ;;  %v343_v19 = vld [vmem:[#allocation7 + $0xb8] sm:$0xff] }
  0x80   :  { %1034 = vmatprep.subr.bf16.mxu1 %v1346_v0  ;;  %v1064_v20 = vpack.c.bf16 %v338_v17, %v336_v16  ;;  %v1066_v21 = vpack.c.bf16 %v343_v19, %v341_v18  ;;  %v340_v22 = vld [vmem:[#allocation7 + $0xa0] sm:$0xff]  ;;  %v342_v23 = vld [vmem:[#allocation7 + $0xb0] sm:$0xff]  ;;  %v345_v24 = vld [vmem:[#allocation7 + $0xc8] sm:$0xff] }
  0x81   :  { %1012 = vmatpush3.bf16.msra.mxu0 %v1011_v27  ;;  %v347_v25 = vld [vmem:[#allocation7 + $0xd8] sm:$0xff]  ;;  %v1068_v26 = vpack.c.bf16 %v342_v23, %v340_v22  ;;  %v344_v28 = vld [vmem:[#allocation7 + $0xc0] sm:$0xff]  ;;  %v346_v29 = vld [vmem:[#allocation7 + $0xd0] sm:$0xff] }
  0x82   :  { %1013 = vmatprep.subr.bf16.mxu0 %v1346_v0  ;;  %v1070_v27 = vpack.c.bf16 %v347_v25, %v345_v24  ;;  %v1072_v30 = vpack.c.bf16 %v346_v29, %v344_v28  ;;  %v750_v31 = vld [vmem:[%s1604_s2] ss:$0 sm:$0xff]  ;;  %v351_v37 = vld [vmem:[#allocation7 + $0xf8] sm:$0xff]  ;;  %v350_v40 = vld [vmem:[#allocation7 + $0xf0] sm:$0xff] }
  0x83   :  { %1036 = vmatpush3.bf16.msra.mxu1 %v1035_v36  ;;  %v349_v36 = vld [vmem:[#allocation7 + $0xe8] sm:$0xff]  ;;  %v436_v44 = vld [vmem:[#allocation8] sm:$0xff]  ;;  %v455_v48 = vld [vmem:[#allocation8 + $0x98] sm:$0xff] }
  0x84   :  { %1037 = vmatprep.subr.bf16.mxu1 %v1346_v0  ;;  %v1074_v38 = vpack.c.bf16 %v351_v37, %v349_v36  ;;  %v453_v43 = vld [vmem:[#allocation8 + $0x88] sm:$0xff]  ;;  %v438_v51 = vld [vmem:[#allocation8 + $0x10] sm:$0xff]  ;;  %v439_v52 = vld [vmem:[#allocation8 + $0x18] sm:$0xff] }
  0x85   :  { %1015 = vmatpush3.bf16.msra.mxu0 %v1014_v33  ;;  %v456_v53 = vld [vmem:[#allocation8 + $0xa0] sm:$0xff]  ;;  %v1084_v55 = vpack.c.bf16 %v439_v52, %v438_v51  ;;  %v459_v60 = vld [vmem:[#allocation8 + $0xb8] sm:$0xff]  ;;  %v442_v63 = vld [vmem:[#allocation8 + $0x30] sm:$0xff]  ;;  %v353_v51 = vlaneseq }
  0x86   :  { %1016 = vmatprep.subr.bf16.mxu0 %v1346_v0  ;;  %v440_v57 = vld [vmem:[#allocation8 + $0x20] sm:$0xff]  ;;  %v461_v4 = vld [vmem:[#allocation8 + $0xc8] sm:$0xff]  ;;  %v463_v10 = vld [vmem:[#allocation8 + $0xd8] sm:$0xff] }
  0x87   :  { %1039 = vmatpush3.bf16.msra.mxu1 %v1038_v42  ;;  %v452_v42 = vld [vmem:[#allocation8 + $0x80] sm:$0xff]  ;;  %v446_v13 = vld [vmem:[#allocation8 + $0x50] sm:$0xff]  ;;  %v465_v16 = vld [vmem:[#allocation8 + $0xe8] sm:$0xff]  ;;  %v354_v52 = vshrl.u32 %v353_v51, 7 }
  0x88   :  { %1040 = vmatprep.subr.bf16.mxu1 %v1346_v0  ;;  %v444_v7 = vld [vmem:[#allocation8 + $0x40] sm:$0xff]  ;;  %v449_v25 = vld [vmem:[#allocation8 + $0x68] sm:$0xff]  ;;  %v467_v28 = vld [vmem:[#allocation8 + $0xf8] sm:$0xff] }
  0x89   :  { %1018 = vmatpush3.bf16.msra.mxu0 %v1017_v39  ;;  %v348_v39 = vld [vmem:[#allocation7 + $0xe0] sm:$0xff]  ;;  %v548_v37 = vld [vmem:[#allocation10 + $0x18] sm:$0xff] }
  0x8a   :  { %1019 = vmatprep.subr.bf16.mxu0 %v1346_v0  ;;  %v1076_v41 = vpack.c.bf16 %v350_v40, %v348_v39  ;;  %v751_v19 = vld [vmem:[%s1606_s4] ss:$0 sm:$0xff]  ;;  %v550_v40 = vld [vmem:[#allocation10 + $0x28] sm:$0xff] }
  0x8b   :  { %1042 = vmatpush3.bf16.msra.mxu1 %v1041_v46  ;;  %v437_v46 = vld [vmem:[#allocation8 + $0x8] sm:$0xff]  ;;  %v448_v24 = vld [vmem:[#allocation8 + $0x60] sm:$0xff] }
  0x8c   :  { %1043 = vmatprep.subr.bf16.mxu1 %v1346_v0  ;;  %v1080_v49 = vpack.c.bf16 %v437_v46, %v436_v44  ;;  %v549_v39 = vld [vmem:[#allocation10 + $0x20] sm:$0xff]  ;;  %v554_v46 = vld [vmem:[#allocation10 + $0x48] sm:$0xff] }
  0x8d   :  { %1021 = vmatpush3.bf16.msra.mxu0 %v1020_v45  ;;  %v1078_v45 = vpack.c.bf16 %v453_v43, %v452_v42  ;;  %v551_v42 = vld [vmem:[#allocation10 + $0x30] sm:$0xff]  ;;  %v552_v43 = vld [vmem:[#allocation10 + $0x38] sm:$0xff] }
  0x8e   :  { %1047 = vmatprep.subr.bf16.mxu0 %v1046_v54  ;;  %v457_v54 = vld [vmem:[#allocation8 + $0xa8] sm:$0xff]  ;;  %v1120_v44 = vpack.c.bf16 %v552_v43, %v551_v42 }
  0x8f   :  { %1045 = vmatpush3.bf16.msra.mxu1 %v1044_v50  ;;  %v1086_v56 = vpack.c.bf16 %v457_v54, %v456_v53  ;;  %v355_v53 = vsub.s32 0, %v354_v52  ;;  %v129_v54 = vld [vmem:[%s1608_s6] sm:$0x3] }
  0x90   :  { %891 = vmatmul.mubr.f32.vlgmr.msra.gmra.mrb[0].mxu0 %v133_v47  ;;  %v454_v47 = vld [vmem:[#allocation8 + $0x90] sm:$0xff]  ;;  %1079 = vmatprep.subr.bf16.mxu1 %v1078_v45  ;;  %v553_v45 = vld [vmem:[#allocation10 + $0x40] sm:$0xff] }
  0x91   :  { %427 = vmatprep.mubr.f32.mxu0 %v1348_v1  ;;  %1049 = vmatpush1.bf16.msra.mxu0 %v1048_v58  ;;  %v1082_v50 = vpack.c.bf16 %v455_v48, %v454_v47  ;;  %v441_v58 = vld [vmem:[#allocation8 + $0x28] sm:$0xff]  ;;  %v1123_v47 = vpack.c.bf16 %v554_v46, %v553_v45  ;;  %v555_v48 = vld [vmem:[#allocation10 + $0x50] sm:$0xff] }
  0x92   :  { %1051 = vmatprep.subr.bf16.mxu0 %v1050_v59  ;;  %v458_v59 = vld [vmem:[#allocation8 + $0xb0] sm:$0xff]  ;;  %v1088_v61 = vpack.c.bf16 %v441_v58, %v440_v57 }
  0x93   :  { %v1090_v62 = vpack.c.bf16 %v459_v60, %v458_v59 }
  0x95   :  { %1053 = vmatpush1.bf16.msra.mxu0 %v1052_v2  ;;  %v443_v2 = vld [vmem:[#allocation8 + $0x38] sm:$0xff] }
  0x96   :  { %1055 = vmatprep.subr.bf16.mxu0 %v1054_v3  ;;  %v460_v3 = vld [vmem:[#allocation8 + $0xc0] sm:$0xff]  ;;  %v1092_v5 = vpack.c.bf16 %v443_v2, %v442_v63 }
  0x97   :  { %v1094_v6 = vpack.c.bf16 %v461_v4, %v460_v3  ;;  %v557_v2 = vld [vmem:[#allocation10 + $0x60] sm:$0xff]  ;;  %v558_v3 = vld [vmem:[#allocation10 + $0x68] sm:$0xff] }
  0x98   :  { %v1129_v4 = vpack.c.bf16 %v558_v3, %v557_v2 }
  0x99   :  { %1057 = vmatpush1.bf16.msra.mxu0 %v1056_v8  ;;  %v445_v8 = vld [vmem:[#allocation8 + $0x48] sm:$0xff] }
  0x9a   :  { %1059 = vmatprep.subr.bf16.mxu0 %v1058_v9  ;;  %v462_v9 = vld [vmem:[#allocation8 + $0xd0] sm:$0xff]  ;;  %v1096_v11 = vpack.c.bf16 %v445_v8, %v444_v7  ;;  %v638_v8 = vld [vmem:[#allocation11] sm:$0xff] }
  0x9b   :  { %v1098_v12 = vpack.c.bf16 %v463_v10, %v462_v9  ;;  %v639_v9 = vld [vmem:[#allocation11 + $0x8] sm:$0xff]  ;;  %v640_v10 = vld [vmem:[#allocation11 + $0x10] sm:$0xff] }
  0x9d   :  { %1061 = vmatpush1.bf16.msra.mxu0 %v1060_v14  ;;  %v447_v14 = vld [vmem:[#allocation8 + $0x58] sm:$0xff] }
  0x9e   :  { %1063 = vmatprep.subr.bf16.mxu0 %v1062_v15  ;;  %v464_v15 = vld [vmem:[#allocation8 + $0xe0] sm:$0xff]  ;;  %v1100_v17 = vpack.c.bf16 %v447_v14, %v446_v13  ;;  %v643_v14 = vld [vmem:[#allocation11 + $0x28] sm:$0xff] }
  0x9f   :  { %v1102_v18 = vpack.c.bf16 %v465_v16, %v464_v15  ;;  %v644_v16 = vld [vmem:[#allocation11 + $0x30] sm:$0xff] }
  0xa1   :  { %1065 = vmatpush1.bf16.msra.mxu0 %v1064_v20 }
  0xa2   :  { %1067 = vmatprep.subr.bf16.mxu0 %v1066_v21 }
  0xa5   :  { %1069 = vmatpush1.bf16.msra.mxu0 %v1068_v26  ;;  %v1104_v26 = vpack.c.bf16 %v449_v25, %v448_v24  ;;  %v650_v25 = vld [vmem:[#allocation11 + $0x60] sm:$0xff] }
  0xa6   :  { %1071 = vmatprep.subr.bf16.mxu0 %v1070_v27  ;;  %v466_v27 = vld [vmem:[#allocation8 + $0xf0] sm:$0xff] }
  0xa7   :  { %v1106_v29 = vpack.c.bf16 %v467_v28, %v466_v27 }
  0xa9   :  { %1073 = vmatpush1.bf16.msra.mxu0 %v1072_v30  ;;  %v450_v30 = vld [vmem:[#allocation8 + $0x70] sm:$0xff] }
  0xaa   :  { %1075 = vmatprep.subr.bf16.mxu0 %v1074_v38 }
  0xad   :  { %1077 = vmatpush1.bf16.msra.mxu0 %v1076_v41  ;;  %v1117_v41 = vpack.c.bf16 %v550_v40, %v549_v39 }
  0xae   :  { %1110 = vmatprep.subr.bf16.mxu0 %v1346_v0 }
 0x163   :  { %v222_v32 = vpop.f32.mrb[0].mxu0 }
 0x164   :  { %v223_v33 = vadd.f32 %v750_v31, %v222_v32  ;;  %v892_v34 = vpop.f32.mrb[1].mxu0  ;;  %v451_v31 = vld [vmem:[#allocation8 + $0x78] sm:$0xff] }
 0x165   :  { %v1108_v32 = vpack.c.bf16 %v451_v31, %v450_v30  ;;  %v546_v34 = vld [vmem:[#allocation10 + $0x8] sm:$0xff] }
 0x166   :  { %v226_v35 = vmax.f32 %v223_v33, 0.0  ;;  %v545_v33 = vld [vmem:[#allocation10] sm:$0xff] }
 0x167   :  { %v1111_v36 = vpack.c.bf16 %v546_v34, %v545_v33  ;;  %v652_v34 = vld [vmem:[#allocation11 + $0x70] sm:$0xff] }
 0x168   :  { %926 = vmatmul.mubr.f32.vlgmr.msra.gmra.mrb[0].mxu1 %v226_v35  ;;  %v547_v35 = vld [vmem:[#allocation10 + $0x10] sm:$0xff] }
 0x169   :  { %1081 = vmatpush3.bf16.msra.mxu1 %v1080_v49  ;;  %v1114_v38 = vpack.c.bf16 %v548_v37, %v547_v35  ;;  %v556_v49 = vld [vmem:[#allocation10 + $0x58] sm:$0xff]  ;;  %v753_v37 = vld [vmem:[%s1612_s10] ss:$0 sm:$0xff] }
 0x16a   :  { %1083 = vmatprep.subr.bf16.mxu1 %v1082_v50  ;;  %v1126_v50 = vpack.c.bf16 %v556_v49, %v555_v48  ;;  %v653_v35 = vld [vmem:[#allocation11 + $0x78] sm:$0xff] }
 0x16d   :  { %1085 = vmatpush3.bf16.msra.mxu1 %v1084_v55  ;;  %v359_v55 = vsub.s32 1, %v354_v52 }
 0x16e   :  { %1087 = vmatprep.subr.bf16.mxu1 %v1086_v56  ;;  %v356_v56 = vrot.slane %v129_v54, %v355_v53 }
 0x16f   :  { %v360_v57 = vrot.slane %v129_v54, %v359_v55 }
 0x171   :  { %1089 = vmatpush3.bf16.msra.mxu1 %v1088_v61 }
 0x172   :  { %1091 = vmatprep.subr.bf16.mxu1 %v1090_v62 }
 0x175   :  { %1093 = vmatpush3.bf16.msra.mxu1 %v1092_v5  ;;  %v559_v5 = vld [vmem:[#allocation10 + $0x70] sm:$0xff] }
 0x176   :  { %1095 = vmatprep.subr.bf16.mxu1 %v1094_v6  ;;  %v560_v6 = vld [vmem:[#allocation10 + $0x78] sm:$0xff] }
 0x177   :  { %v1132_v7 = vpack.c.bf16 %v560_v6, %v559_v5 }
 0x179   :  { %1097 = vmatpush3.bf16.msra.mxu1 %v1096_v11  ;;  %v1135_v11 = vpack.c.bf16 %v639_v9, %v638_v8 }
 0x17a   :  { %1099 = vmatprep.subr.bf16.mxu1 %v1098_v12  ;;  %v641_v12 = vld [vmem:[#allocation11 + $0x18] sm:$0xff] }
 0x17b   :  { %v1138_v13 = vpack.c.bf16 %v641_v12, %v640_v10 }
 0x17d   :  { %1101 = vmatpush3.bf16.msra.mxu1 %v1100_v17  ;;  %v645_v17 = vld [vmem:[#allocation11 + $0x38] sm:$0xff] }
 0x17e   :  { %1103 = vmatprep.subr.bf16.mxu1 %v1102_v18  ;;  %v1144_v18 = vpack.c.bf16 %v645_v17, %v644_v16 }
 0x181   :  { %1105 = vmatpush3.bf16.msra.mxu1 %v1104_v26  ;;  %v651_v26 = vld [vmem:[#allocation11 + $0x68] sm:$0xff] }
 0x182   :  { %1107 = vmatprep.subr.bf16.mxu1 %v1106_v29  ;;  %v1153_v27 = vpack.c.bf16 %v651_v26, %v650_v25  ;;  %v752_v29 = vld [vmem:[%s1610_s8] ss:$0 sm:$0xff] }
 0x185   :  { %1109 = vmatpush3.bf16.msra.mxu1 %v1108_v32 }
 0x186   :  { %1134 = vmatprep.subr.bf16.mxu1 %v1346_v0 }
 0x23b   :  { %v315_v20 = vpop.f32.mrb[0].mxu1 }
 0x23c   :  { %v316_v21 = vadd.f32 %v751_v19, %v315_v20  ;;  %v927_v22 = vpop.f32.mrb[1].mxu1  ;;  %v646_v19 = vld [vmem:[#allocation11 + $0x40] sm:$0xff]  ;;  %v647_v20 = vld [vmem:[#allocation11 + $0x48] sm:$0xff] }
 0x23d   :  { %v648_v22 = vld [vmem:[#allocation11 + $0x50] sm:$0xff] }
 0x23e   :  { %v319_v23 = vmax.f32 %v316_v21, 0.0  ;;  %v1147_v21 = vpack.c.bf16 %v647_v20, %v646_v19 }
 0x240   :  { %428 = vmatmul.mubr.f32.vlgmr.msra.gmra.mrb[2].mxu0 %v319_v23  ;;  %v649_v23 = vld [vmem:[#allocation11 + $0x58] sm:$0xff] }
 0x241   :  { %960 = vmatprep.mubr.msk.f32.mxu0 %vm1347_vm0, %v1348_v1  ;;  %1112 = vmatpush3.bf16.msra.mxu0 %v1111_v36  ;;  %v1150_v24 = vpack.c.bf16 %v649_v23, %v648_v22  ;;  %v1156_v36 = vpack.c.bf16 %v653_v35, %v652_v34 }
 0x242   :  { %1113 = vmatprep.subr.bf16.mxu0 %v1346_v0 }
 0x245   :  { %1115 = vmatpush3.bf16.msra.mxu0 %v1114_v38 }
 0x246   :  { %1116 = vmatprep.subr.bf16.mxu0 %v1346_v0 }
 0x249   :  { %1118 = vmatpush3.bf16.msra.mxu0 %v1117_v41  ;;  %v754_v41 = vld [vmem:[%s1614_s12] ss:$0 sm:$0xff] }
 0x24a   :  { %1119 = vmatprep.subr.bf16.mxu0 %v1346_v0 }
 0x24d   :  { %1121 = vmatpush3.bf16.msra.mxu0 %v1120_v44 }
 0x24e   :  { %1122 = vmatprep.subr.bf16.mxu0 %v1346_v0 }
 0x251   :  { %1124 = vmatpush3.bf16.msra.mxu0 %v1123_v47 }
 0x252   :  { %1125 = vmatprep.subr.bf16.mxu0 %v1346_v0 }
 0x255   :  { %1127 = vmatpush3.bf16.msra.mxu0 %v1126_v50 }
 0x256   :  { %1128 = vmatprep.subr.bf16.mxu0 %v1346_v0 }
 0x259   :  { %1130 = vmatpush3.bf16.msra.mxu0 %v1129_v4 }
 0x25a   :  { %1131 = vmatprep.subr.bf16.mxu0 %v1346_v0 }
 0x25d   :  { %1133 = vmatpush3.bf16.msra.mxu0 %v1132_v7 }
 0x313   :  { %v429_v58 = vpop.f32.mrb[2].mxu0 }
 0x314   :  { %v430_v59 = vadd.f32 %v429_v58, %v356_v56  ;;  %v431_v60 = vpop.f32.mrb[3].mxu0 }
 0x315   :  { %v432_v61 = vadd.f32 %v431_v60, %v360_v57 }
 0x316   :  { %v434_v63 = vmax.f32 %v430_v59, 0.0 }
 0x317   :  { %v435_v62 = vmax.f32 %v432_v61, 0.0 }
 0x319   :  { %538 = vmatprep.mubr.f32.mxu1 %v435_v62 }
 0x31a   :  { %539 = vmatmul.mubr.f32.vlgmr.msra.gmra.mrb[2].mxu1 %v434_v63 }
 0x31b   :  { %995 = vmatprep.mubr.msk.f32.mxu1 %vm1347_vm0, %v1348_v1  ;;  %1136 = vmatpush3.bf16.msra.mxu1 %v1135_v11  ;;  %v642_v1 = vld [vmem:[#allocation11 + $0x20] sm:$0xff] }
 0x31c   :  { %1137 = vmatprep.subr.bf16.mxu1 %v1346_v0  ;;  %v1141_v15 = vpack.c.bf16 %v643_v14, %v642_v1 }
 0x31f   :  { %1139 = vmatpush3.bf16.msra.mxu1 %v1138_v13 }
 0x320   :  { %1140 = vmatprep.subr.bf16.mxu1 %v1346_v0 }
 0x323   :  { %1142 = vmatpush3.bf16.msra.mxu1 %v1141_v15 }
 0x324   :  { %1143 = vmatprep.subr.bf16.mxu1 %v1346_v0 }
 0x327   :  { %1145 = vmatpush3.bf16.msra.mxu1 %v1144_v18 }
 0x328   :  { %1146 = vmatprep.subr.bf16.mxu1 %v1346_v0 }
 0x32b   :  { %1148 = vmatpush3.bf16.msra.mxu1 %v1147_v21 }
 0x32c   :  { %1149 = vmatprep.subr.bf16.mxu1 %v1346_v0 }
 0x32f   :  { %1151 = vmatpush3.bf16.msra.mxu1 %v1150_v24 }
 0x330   :  { %1152 = vmatprep.subr.bf16.mxu1 %v1346_v0 }
 0x333   :  { %1154 = vmatpush3.bf16.msra.mxu1 %v1153_v27 }
 0x334   :  { %1155 = vmatprep.subr.bf16.mxu1 %v1346_v0 }
 0x337   :  { %1157 = vmatpush3.bf16.msra.mxu1 %v1156_v36 }
 0x3ed   :  { %v821_v28 = vpop.f32.mrb[2].mxu1 }
 0x3ee   :  { %v822_v30 = vpop.f32.mrb[3].mxu1 }
 0x3ef   :  { %v823_v31 = vadd.f32 %v822_v30, %v821_v28 }
 0x3f1   :  { %v541_v32 = vadd.f32 %v823_v31, %v752_v29 }
 0x3f3   :  { %v544_v33 = vmax.f32 %v541_v32, 0.0 }
 0x3f5   :  { %961 = vmatmul.mubr.f32.vlgmr.msra.gmra.mrb[4].mxu0 %v544_v33 }
 0x4c8   :  { %v633_v38 = vpop.f32.mrb[4].mxu0 }
 0x4c9   :  { %v634_v0 = vadd.f32 %v753_v37, %v633_v38  ;;  %v962_v39 = vpop.f32.mrb[5].mxu0 }
 0x4cb   :  { %v637_v40 = vmax.f32 %v634_v0, 0.0 }
 0x4cd   :  { %996 = vmatmul.mubr.f32.vlgmr.msra.gmra.mrb[4].mxu1 %v637_v40 }
 0x5a0   :  { %v726_v42 = vpop.f32.mrb[4].mxu1 }
 0x5a1   :  { %v727_v43 = vadd.f32 %v754_v41, %v726_v42  ;;  %v997_v44 = vpop.f32.mrb[5].mxu1 }
 0x5a3   :  { %v730_v45 = vmax.f32 %v727_v43, 0.0 }
 0x5a5   :  { %731 = vst [vmem:[#allocation13] sm:$0xff] %v730_v45 }
 0x5a6   :  { %1315 = shalt.err (!%p1312_p10)
}
 0x5a7   :  { %s1316_s25 = scalar_lea.hbm %s1615_s13, 128 }
 0x5a8   :  { %p1317_p11 = scmp.ne.s32.totalorder %s1615_s13, %s1316_s25  ;;  %p1320_p12 = scmp.lt.u32.totalorder %s1316_s25, %s1615_s13 }
 0x5aa   :  { %p1322_p13 = pnand %p1320_p12, %p1317_p11 }
 0x5ac   :  { %1325 = shalt.err (!%p1322_p13)
}
 0x5ad   :  { %741 = dma.vmem_to_hbm [thread:$0]  %s739_s5, 128, %s1615_s13, [#allocation4]  }
 0x5ae   :  { %1334 = dma.done.wait [#allocation4], 128  }
 0x5af   :  { %1335 = vsyncadd [#allocation4], 4294967168 }
 0x5b0   :  { %745 = vsyncpa [#allocation3], 1 }
 0x5b1   :  { %746 = vsyncpa [#allocation6], 1 }
 0x5b2   :  { %747 = vsyncpa [#allocation9], 1 }
 0x5b3   :  { %748 = vsyncpa [#allocation12], 1 }
 0x5b4   :  { %749 = vsyncpa [#allocation4], 1 }

// kernel: _mlp_forward_impl.1
= control target key start
LH: loop header
LB: loop body
LE: loop exit
PB: predicated region body
PF: predicated region fallthrough
CT: control target
= control target key end

     0   :  { %18 = vsyncpa [#allocation3], 0  ;;  %s1602_s0 = inlined_call_operand.vmem [shape: f32[8,128], index: 0, kind: input, shape index: {}]   ;;  %s1603_s1 = inlined_call_operand.hbm [shape: f32[128,128], index: 1, kind: input, shape index: {}]   ;;  %s1604_s2 = inlined_call_operand.vmem [shape: f32[1,128], index: 2, kind: input, shape index: {}]   ;;  %s1605_s3 = inlined_call_operand.hbm [shape: f32[128,128], index: 3, kind: input, shape index: {}]   ;;  %s1606_s4 = inlined_call_operand.vmem [shape: f32[1,128], index: 4, kind: input, shape index: {}]   ;;  %s1607_s5 = inlined_call_operand.hbm [shape: f32[128,256], index: 5, kind: input, shape index: {}]   ;;  %s1608_s6 = inlined_call_operand.vmem [shape: f32[1,256], index: 6, kind: input, shape index: {}]   ;;  %s1609_s7 = inlined_call_operand.hbm [shape: f32[256,128], index: 7, kind: input, shape index: {}]   ;;  %s1610_s8 = inlined_call_operand.vmem [shape: f32[1,128], index: 8, kind: input, shape index: {}]   ;;  %s1611_s9 = inlined_call_operand.hbm [shape: f32[128,128], index: 9, kind: input, shape index: {}]   ;;  %s1612_s10 = inlined_call_operand.vmem [shape: f32[1,128], index: 10, kind: input, shape index: {}]   ;;  %s1613_s11 = inlined_call_operand.hbm [shape: f32[128,128], index: 11, kind: input, shape index: {}]   ;;  %s1614_s12 = inlined_call_operand.vmem [shape: f32[1,128], index: 12, kind: input, shape index: {}]   ;;  %s1615_s13 = inlined_call_operand.hbm [shape: f32[8,128], index: 13, kind: output, shape index: {}]  }
   0x1   :  { %19 = vsyncpa [#allocation6], 0 }
   0x2   :  { %20 = vsyncpa [#allocation9], 0 }
   0x3   :  { %21 = vsyncpa [#allocation12], 0 }
   0x4   :  { %22 = vsyncpa [#allocation4], 0  ;;  %s1336_s25 = smov [#allocation5]   ;;  %s1337_s27 = smov [#allocation8]  }
   0x5   :  { %s44_s26 = sshll.u32 %s1336_s25, 4  ;;  %s72_s28 = sshll.u32 %s1337_s27, 4  ;;  %s45_s26 = int_to_ptr.vmem [resolvable:$true] %s44_s26  ;;  %s1420_s28 = int_to_ptr.vmem [resolvable:$true] %s72_s28 }
   0x6   :  { %s1172_s14 = scalar_lea.hbm %s1605_s3, 2048 }
   0x7   :  { %p1173_p0 = scmp.ne.s32.totalorder %s1605_s3, %s1172_s14  ;;  %p1176_p1 = scmp.lt.u32.totalorder %s1172_s14, %s1605_s3 }
   0x9   :  { %p1178_p2 = pnand %p1176_p1, %p1173_p0 }
   0xb   :  { %1181 = shalt.err (!%p1178_p2)
}
   0xc   :  { %s1182_s19 = scalar_lea.vmem %s45_s26, 2048  ;;  %p1187_p4 = scmp.lt.s32.totalorder %s45_s26, %s45_s26 }
   0xd   :  { %p1183_p3 = scmp.ne.s32.totalorder %s45_s26, %s1182_s19  ;;  %p1188_p5 = scmp.lt.s32.totalorder %s1182_s19, %s1182_s19 }
   0xf   :  { %p1189_p6 = por %p1188_p5, %p1187_p4 }
  0x11   :  { %p1190_p7 = pnand %p1189_p6, %p1183_p3 }
  0x13   :  { %1193 = shalt.err (!%p1190_p7)
}
  0x14   :  { %s1338_s20 = smov 128   ;;  %s1339_s21 = smov 8  }
  0x15   :  { %50 = dma.hbm_to_vmem [thread:$0]  %s1605_s3, 2048, %s45_s26, [#allocation6], %s1338_s20, %s1338_s20, %s1339_s21  }
  0x16   :  { %s1194_s27 = scalar_lea.hbm %s1609_s7, 4096 }
  0x17   :  { %p1195_p8 = scmp.ne.s32.totalorder %s1609_s7, %s1194_s27  ;;  %p1198_p9 = scmp.lt.u32.totalorder %s1194_s27, %s1609_s7 }
  0x19   :  { %p1200_p10 = pnand %p1198_p9, %p1195_p8 }
  0x1b   :  { %1203 = shalt.err (!%p1200_p10)
}
  0x1c   :  { %s1204_s16 = scalar_lea.vmem %s1420_s28, 4096  ;;  %p1209_p12 = scmp.lt.s32.totalorder %s1420_s28, %s1420_s28 }
  0x1d   :  { %p1205_p11 = scmp.ne.s32.totalorder %s1420_s28, %s1204_s16  ;;  %p1210_p13 = scmp.lt.s32.totalorder %s1204_s16, %s1204_s16 }
  0x1f   :  { %p1211_p0 = por %p1210_p13, %p1209_p12 }
  0x21   :  { %p1212_p1 = pnand %p1211_p0, %p1205_p11 }
  0x23   :  { %1215 = shalt.err (!%p1212_p1)
}
  0x24   :  { %78 = dma.hbm_to_vmem [thread:$0]  %s1609_s7, 4096, %s1420_s28, [#allocation9], %s1338_s20, %s1338_s20, %s1339_s21  }
  0x25   :  { %s1340_s17 = smov [#allocation2]   ;;  %s1341_s19 = smov [#allocation7]  }
  0x26   :  { %s30_s18 = sshll.u32 %s1340_s17, 4  ;;  %s58_s22 = sshll.u32 %s1341_s19, 4  ;;  %s31_s18 = int_to_ptr.vmem [resolvable:$true] %s30_s18  ;;  %s1457_s22 = int_to_ptr.vmem [resolvable:$true] %s58_s22 }
  0x27   :  { %s1216_s25 = scalar_lea.hbm %s1603_s1, 2048 }
  0x28   :  { %p1217_p2 = scmp.ne.s32.totalorder %s1603_s1, %s1216_s25  ;;  %p1220_p3 = scmp.lt.u32.totalorder %s1216_s25, %s1603_s1 }
  0x2a   :  { %p1222_p4 = pnand %p1220_p3, %p1217_p2 }
  0x2c   :  { %1225 = shalt.err (!%p1222_p4)
}
  0x2d   :  { %s1226_s7 = scalar_lea.vmem %s31_s18, 2048  ;;  %p1231_p6 = scmp.lt.s32.totalorder %s31_s18, %s31_s18 }
  0x2e   :  { %p1227_p5 = scmp.ne.s32.totalorder %s31_s18, %s1226_s7  ;;  %p1232_p7 = scmp.lt.s32.totalorder %s1226_s7, %s1226_s7 }
  0x30   :  { %p1233_p8 = por %p1232_p7, %p1231_p6 }
  0x32   :  { %p1234_p9 = pnand %p1233_p8, %p1227_p5 }
  0x34   :  { %1237 = shalt.err (!%p1234_p9)
}
  0x35   :  { %36 = dma.hbm_to_vmem [thread:$0]  %s1603_s1, 2048, %s31_s18, [#allocation3], %s1338_s20, %s1338_s20, %s1339_s21  }
  0x36   :  { %s1238_s26 = scalar_lea.hbm %s1607_s5, 4096 }
  0x37   :  { %p1239_p10 = scmp.ne.s32.totalorder %s1607_s5, %s1238_s26  ;;  %p1242_p11 = scmp.lt.u32.totalorder %s1238_s26, %s1607_s5 }
  0x39   :  { %p1244_p12 = pnand %p1242_p11, %p1239_p10 }
  0x3b   :  { %1247 = shalt.err (!%p1244_p12)
}
  0x3c   :  { %s1248_s25 = scalar_lea.vmem %s1457_s22, 4096  ;;  %p1253_p0 = scmp.lt.s32.totalorder %s1457_s22, %s1457_s22 }
  0x3d   :  { %p1249_p13 = scmp.ne.s32.totalorder %s1457_s22, %s1248_s25  ;;  %p1254_p1 = scmp.lt.s32.totalorder %s1248_s25, %s1248_s25 }
  0x3f   :  { %p1255_p2 = por %p1254_p1, %p1253_p0 }
  0x41   :  { %p1256_p3 = pnand %p1255_p2, %p1249_p13 }
  0x43   :  { %1259 = shalt.err (!%p1256_p3)
}
  0x44   :  { %s1342_s1 = smov 256   ;;  %s1343_s18 = smov 16  }
  0x45   :  { %64 = dma.hbm_to_vmem [thread:$0]  %s1607_s5, 4096, %s1457_s22, [#allocation6], %s1342_s1, %s1342_s1, %s1343_s18  }
  0x46   :  { %s1344_s30 = smov [#allocation10]   ;;  %s1345_s7 = smov [#allocation11]  }
  0x47   :  { %s86_s14 = sshll.u32 %s1344_s30, 4  ;;  %s100_s28 = sshll.u32 %s1345_s7, 4  ;;  %s87_s14 = int_to_ptr.vmem [resolvable:$true] %s86_s14  ;;  %s1491_s28 = int_to_ptr.vmem [resolvable:$true] %s100_s28 }
  0x48   :  { %s1260_s3 = scalar_lea.hbm %s1611_s9, 2048 }
  0x49   :  { %p1261_p4 = scmp.ne.s32.totalorder %s1611_s9, %s1260_s3  ;;  %p1264_p5 = scmp.lt.u32.totalorder %s1260_s3, %s1611_s9 }
  0x4b   :  { %p1266_p6 = pnand %p1264_p5, %p1261_p4 }
  0x4d   :  { %1269 = shalt.err (!%p1266_p6)
}
  0x4e   :  { %s1270_s5 = scalar_lea.vmem %s87_s14, 2048  ;;  %p1275_p8 = scmp.lt.s32.totalorder %s87_s14, %s87_s14 }
  0x4f   :  { %p1271_p7 = scmp.ne.s32.totalorder %s87_s14, %s1270_s5  ;;  %p1276_p9 = scmp.lt.s32.totalorder %s1270_s5, %s1270_s5 }
  0x51   :  { %p1277_p10 = por %p1276_p9, %p1275_p8 }
  0x53   :  { %p1278_p11 = pnand %p1277_p10, %p1271_p7 }
  0x55   :  { %1281 = shalt.err (!%p1278_p11)
}
  0x56   :  { %92 = dma.hbm_to_vmem [thread:$0]  %s1611_s9, 2048, %s87_s14, [#allocation9], %s1338_s20, %s1338_s20, %s1339_s21  }
  0x57   :  { %s1282_s18 = scalar_lea.hbm %s1613_s11, 2048 }
  0x58   :  { %p1283_p12 = scmp.ne.s32.totalorder %s1613_s11, %s1282_s18  ;;  %p1286_p13 = scmp.lt.u32.totalorder %s1282_s18, %s1613_s11 }
  0x5a   :  { %p1288_p0 = pnand %p1286_p13, %p1283_p12 }
  0x5c   :  { %1291 = shalt.err (!%p1288_p0)
}
  0x5d   :  { %s1292_s15 = scalar_lea.vmem %s1491_s28, 2048  ;;  %p1297_p2 = scmp.lt.s32.totalorder %s1491_s28, %s1491_s28 }
  0x5e   :  { %p1293_p1 = scmp.ne.s32.totalorder %s1491_s28, %s1292_s15  ;;  %p1298_p3 = scmp.lt.s32.totalorder %s1292_s15, %s1292_s15 }
  0x60   :  { %p1299_p4 = por %p1298_p3, %p1297_p2 }
  0x62   :  { %p1300_p5 = pnand %p1299_p4, %p1293_p1 }
  0x64   :  { %1303 = shalt.err (!%p1300_p5)
}
  0x65   :  { %106 = dma.hbm_to_vmem [thread:$0]  %s1613_s11, 2048, %s1491_s28, [#allocation12], %s1338_s20, %s1338_s20, %s1339_s21  }
  0x66   :  { %1326 = dma.done.wait [#allocation3], 2048  }
  0x67   :  { %1327 = vsyncadd [#allocation3], 4294965248 }
  0x68   :  { %1328 = dma.done.wait [#allocation6], 6144  }
  0x69   :  { %1329 = vsyncadd [#allocation6], 4294961152 }
  0x6a   :  { %1330 = dma.done.wait [#allocation9], 6144  }
  0x6b   :  { %1331 = vsyncadd [#allocation9], 4294961152 }
  0x6c   :  { %1332 = dma.done.wait [#allocation12], 2048  }
  0x6d   :  { %1333 = vsyncadd [#allocation12], 4294965248  ;;  %v1346_v0 = vmov 0.0|0.0   ;;  %vm1347_vm0 = vmmov 0   ;;  %v1348_v1 = vmov 0.0   ;;  %v134_v2 = vld [vmem:[#allocation2] sm:$0xff] }
  0x6e   :  { %998 = vmatprep.subr.bf16.mxu0 %v1346_v0  ;;  %890 = vmatprep.mubr.msk.f32.mxu0 %vm1347_vm0, %v1348_v1  ;;  %v135_v3 = vld [vmem:[#allocation2 + $0x8] sm:$0xff]  ;;  %v136_v4 = vld [vmem:[#allocation2 + $0x10] sm:$0xff]  ;;  %v137_v6 = vld [vmem:[#allocation2 + $0x18] sm:$0xff]  ;;  %s1349_s23 = smov [#allocation13]  }
  0x6f   :  { %1022 = vmatprep.subr.bf16.mxu1 %v1346_v0  ;;  %925 = vmatprep.mubr.msk.f32.mxu1 %vm1347_vm0, %v1348_v1  ;;  %v999_v5 = vpack.c.bf16 %v135_v3, %v134_v2  ;;  %v1002_v7 = vpack.c.bf16 %v137_v6, %v136_v4  ;;  %v138_v8 = vld [vmem:[#allocation2 + $0x20] sm:$0xff]  ;;  %v139_v9 = vld [vmem:[#allocation2 + $0x28] sm:$0xff]  ;;  %v229_v12 = vld [vmem:[#allocation5 + $0x10] sm:$0xff]  ;;  %s738_s5 = sshll.u32 %s1349_s23, 4  ;;  %s739_s5 = int_to_ptr.vmem [resolvable:$true] %s738_s5 }
  0x70   :  { %v227_v10 = vld [vmem:[#allocation5] sm:$0xff]  ;;  %v228_v11 = vld [vmem:[#allocation5 + $0x8] sm:$0xff]  ;;  %v230_v13 = vld [vmem:[#allocation5 + $0x18] sm:$0xff]  ;;  %v1005_v14 = vpack.c.bf16 %v139_v9, %v138_v8  ;;  %s1304_s22 = scalar_lea.vmem %s739_s5, 128  ;;  %p1309_p7 = scmp.lt.s32.totalorder %s739_s5, %s739_s5 }
  0x71   :  { %1000 = vmatpush3.bf16.msra.mxu0 %v999_v5  ;;  %v1023_v15 = vpack.c.bf16 %v228_v11, %v227_v10  ;;  %v140_v16 = vld [vmem:[#allocation2 + $0x30] sm:$0xff]  ;;  %v141_v17 = vld [vmem:[#allocation2 + $0x38] sm:$0xff]  ;;  %v1026_v18 = vpack.c.bf16 %v230_v13, %v229_v12  ;;  %v231_v19 = vld [vmem:[#allocation5 + $0x20] sm:$0xff]  ;;  %p1305_p6 = scmp.ne.s32.totalorder %s739_s5, %s1304_s22  ;;  %p1310_p8 = scmp.lt.s32.totalorder %s1304_s22, %s1304_s22 }
  0x72   :  { %1001 = vmatprep.subr.bf16.mxu0 %v1346_v0  ;;  %v232_v20 = vld [vmem:[#allocation5 + $0x28] sm:$0xff]  ;;  %v1008_v21 = vpack.c.bf16 %v141_v17, %v140_v16  ;;  %v142_v22 = vld [vmem:[#allocation2 + $0x40] sm:$0xff]  ;;  %v233_v25 = vld [vmem:[#allocation5 + $0x30] sm:$0xff] }
  0x73   :  { %1024 = vmatpush3.bf16.msra.mxu1 %v1023_v15  ;;  %v143_v23 = vld [vmem:[#allocation2 + $0x48] sm:$0xff]  ;;  %v1029_v24 = vpack.c.bf16 %v232_v20, %v231_v19  ;;  %v234_v26 = vld [vmem:[#allocation5 + $0x38] sm:$0xff]  ;;  %v144_v28 = vld [vmem:[#allocation2 + $0x50] sm:$0xff]  ;;  %p1311_p9 = por %p1310_p8, %p1309_p7 }
  0x74   :  { %1025 = vmatprep.subr.bf16.mxu1 %v1346_v0  ;;  %v1011_v27 = vpack.c.bf16 %v143_v23, %v142_v22  ;;  %v145_v29 = vld [vmem:[#allocation2 + $0x58] sm:$0xff]  ;;  %v1032_v30 = vpack.c.bf16 %v234_v26, %v233_v25  ;;  %v235_v31 = vld [vmem:[#allocation5 + $0x40] sm:$0xff]  ;;  %v236_v32 = vld [vmem:[#allocation5 + $0x48] sm:$0xff] }
  0x75   :  { %1003 = vmatpush3.bf16.msra.mxu0 %v1002_v7  ;;  %v1014_v33 = vpack.c.bf16 %v145_v29, %v144_v28  ;;  %v146_v34 = vld [vmem:[#allocation2 + $0x60] sm:$0xff]  ;;  %v147_v35 = vld [vmem:[#allocation2 + $0x68] sm:$0xff]  ;;  %v1035_v36 = vpack.c.bf16 %v236_v32, %v235_v31  ;;  %v237_v37 = vld [vmem:[#allocation5 + $0x50] sm:$0xff]  ;;  %p1312_p10 = pnand %p1311_p9, %p1305_p6 }
  0x76   :  { %1004 = vmatprep.subr.bf16.mxu0 %v1346_v0  ;;  %v238_v38 = vld [vmem:[#allocation5 + $0x58] sm:$0xff]  ;;  %v1017_v39 = vpack.c.bf16 %v147_v35, %v146_v34  ;;  %v148_v40 = vld [vmem:[#allocation2 + $0x70] sm:$0xff]  ;;  %v239_v43 = vld [vmem:[#allocation5 + $0x60] sm:$0xff] }
  0x77   :  { %1027 = vmatpush3.bf16.msra.mxu1 %v1026_v18  ;;  %v149_v41 = vld [vmem:[#allocation2 + $0x78] sm:$0xff]  ;;  %v1038_v42 = vpack.c.bf16 %v238_v38, %v237_v37  ;;  %v240_v44 = vld [vmem:[#allocation5 + $0x68] sm:$0xff]  ;;  %v133_v47 = vld [vmem:[%s1602_s0] sm:$0xff] }
  0x78   :  { %1028 = vmatprep.subr.bf16.mxu1 %v1346_v0  ;;  %v1020_v45 = vpack.c.bf16 %v149_v41, %v148_v40  ;;  %v1041_v46 = vpack.c.bf16 %v240_v44, %v239_v43  ;;  %v241_v48 = vld [vmem:[#allocation5 + $0x70] sm:$0xff]  ;;  %v242_v49 = vld [vmem:[#allocation5 + $0x78] sm:$0xff]  ;;  %v321_v51 = vld [vmem:[#allocation7 + $0x8] sm:$0xff] }
  0x79   :  { %1006 = vmatpush3.bf16.msra.mxu0 %v1005_v14  ;;  %v1044_v50 = vpack.c.bf16 %v242_v49, %v241_v48  ;;  %v323_v52 = vld [vmem:[#allocation7 + $0x18] sm:$0xff]  ;;  %v320_v53 = vld [vmem:[#allocation7] sm:$0xff]  ;;  %v322_v55 = vld [vmem:[#allocation7 + $0x10] sm:$0xff] }
  0x7a   :  { %1007 = vmatprep.subr.bf16.mxu0 %v1346_v0  ;;  %v1046_v54 = vpack.c.bf16 %v323_v52, %v321_v51  ;;  %v325_v56 = vld [vmem:[#allocation7 + $0x28] sm:$0xff]  ;;  %v327_v57 = vld [vmem:[#allocation7 + $0x38] sm:$0xff]  ;;  %v1048_v58 = vpack.c.bf16 %v322_v55, %v320_v53  ;;  %v324_v60 = vld [vmem:[#allocation7 + $0x20] sm:$0xff] }
  0x7b   :  { %1030 = vmatpush3.bf16.msra.mxu1 %v1029_v24  ;;  %v1050_v59 = vpack.c.bf16 %v327_v57, %v325_v56  ;;  %v326_v61 = vld [vmem:[#allocation7 + $0x30] sm:$0xff]  ;;  %v329_v62 = vld [vmem:[#allocation7 + $0x48] sm:$0xff]  ;;  %v331_v63 = vld [vmem:[#allocation7 + $0x58] sm:$0xff] }
  0x7c   :  { %1031 = vmatprep.subr.bf16.mxu1 %v1346_v0  ;;  %v1052_v2 = vpack.c.bf16 %v326_v61, %v324_v60  ;;  %v1054_v3 = vpack.c.bf16 %v331_v63, %v329_v62  ;;  %v328_v4 = vld [vmem:[#allocation7 + $0x40] sm:$0xff]  ;;  %v330_v5 = vld [vmem:[#allocation7 + $0x50] sm:$0xff]  ;;  %v333_v6 = vld [vmem:[#allocation7 + $0x68] sm:$0xff] }
  0x7d   :  { %1009 = vmatpush3.bf16.msra.mxu0 %v1008_v21  ;;  %v335_v7 = vld [vmem:[#allocation7 + $0x78] sm:$0xff]  ;;  %v1056_v8 = vpack.c.bf16 %v330_v5, %v328_v4  ;;  %v332_v10 = vld [vmem:[#allocation7 + $0x60] sm:$0xff]  ;;  %v334_v11 = vld [vmem:[#allocation7 + $0x70] sm:$0xff] }
  0x7e   :  { %1010 = vmatprep.subr.bf16.mxu0 %v1346_v0  ;;  %v1058_v9 = vpack.c.bf16 %v335_v7, %v333_v6  ;;  %v337_v12 = vld [vmem:[#allocation7 + $0x88] sm:$0xff]  ;;  %v339_v13 = vld [vmem:[#allocation7 + $0x98] sm:$0xff]  ;;  %v1060_v14 = vpack.c.bf16 %v334_v11, %v332_v10  ;;  %v336_v16 = vld [vmem:[#allocation7 + $0x80] sm:$0xff] }
  0x7f   :  { %1033 = vmatpush3.bf16.msra.mxu1 %v1032_v30  ;;  %v1062_v15 = vpack.c.bf16 %v339_v13, %v337_v12  ;;  %v338_v17 = vld [vmem:[#allocation7 + $0x90] sm:$0xff]  ;;  %v341_v18 = vld [vmem:[#allocation7 + $0xa8] sm:$0xff]  ;;  %v343_v19 = vld [vmem:[#allocation7 + $0xb8] sm:$0xff] }
  0x80   :  { %1034 = vmatprep.subr.bf16.mxu1 %v1346_v0  ;;  %v1064_v20 = vpack.c.bf16 %v338_v17, %v336_v16  ;;  %v1066_v21 = vpack.c.bf16 %v343_v19, %v341_v18  ;;  %v340_v22 = vld [vmem:[#allocation7 + $0xa0] sm:$0xff]  ;;  %v342_v23 = vld [vmem:[#allocation7 + $0xb0] sm:$0xff]  ;;  %v345_v24 = vld [vmem:[#allocation7 + $0xc8] sm:$0xff] }
  0x81   :  { %1012 = vmatpush3.bf16.msra.mxu0 %v1011_v27  ;;  %v347_v25 = vld [vmem:[#allocation7 + $0xd8] sm:$0xff]  ;;  %v1068_v26 = vpack.c.bf16 %v342_v23, %v340_v22  ;;  %v344_v28 = vld [vmem:[#allocation7 + $0xc0] sm:$0xff]  ;;  %v346_v29 = vld [vmem:[#allocation7 + $0xd0] sm:$0xff] }
  0x82   :  { %1013 = vmatprep.subr.bf16.mxu0 %v1346_v0  ;;  %v1070_v27 = vpack.c.bf16 %v347_v25, %v345_v24  ;;  %v1072_v30 = vpack.c.bf16 %v346_v29, %v344_v28  ;;  %v750_v31 = vld [vmem:[%s1604_s2] ss:$0 sm:$0xff]  ;;  %v351_v37 = vld [vmem:[#allocation7 + $0xf8] sm:$0xff]  ;;  %v350_v40 = vld [vmem:[#allocation7 + $0xf0] sm:$0xff] }
  0x83   :  { %1036 = vmatpush3.bf16.msra.mxu1 %v1035_v36  ;;  %v349_v36 = vld [vmem:[#allocation7 + $0xe8] sm:$0xff]  ;;  %v436_v44 = vld [vmem:[#allocation8] sm:$0xff]  ;;  %v455_v48 = vld [vmem:[#allocation8 + $0x98] sm:$0xff] }
  0x84   :  { %1037 = vmatprep.subr.bf16.mxu1 %v1346_v0  ;;  %v1074_v38 = vpack.c.bf16 %v351_v37, %v349_v36  ;;  %v453_v43 = vld [vmem:[#allocation8 + $0x88] sm:$0xff]  ;;  %v438_v51 = vld [vmem:[#allocation8 + $0x10] sm:$0xff]  ;;  %v439_v52 = vld [vmem:[#allocation8 + $0x18] sm:$0xff] }
  0x85   :  { %1015 = vmatpush3.bf16.msra.mxu0 %v1014_v33  ;;  %v456_v53 = vld [vmem:[#allocation8 + $0xa0] sm:$0xff]  ;;  %v1084_v55 = vpack.c.bf16 %v439_v52, %v438_v51  ;;  %v459_v60 = vld [vmem:[#allocation8 + $0xb8] sm:$0xff]  ;;  %v442_v63 = vld [vmem:[#allocation8 + $0x30] sm:$0xff]  ;;  %v353_v51 = vlaneseq }
  0x86   :  { %1016 = vmatprep.subr.bf16.mxu0 %v1346_v0  ;;  %v440_v57 = vld [vmem:[#allocation8 + $0x20] sm:$0xff]  ;;  %v461_v4 = vld [vmem:[#allocation8 + $0xc8] sm:$0xff]  ;;  %v463_v10 = vld [vmem:[#allocation8 + $0xd8] sm:$0xff] }
  0x87   :  { %1039 = vmatpush3.bf16.msra.mxu1 %v1038_v42  ;;  %v452_v42 = vld [vmem:[#allocation8 + $0x80] sm:$0xff]  ;;  %v446_v13 = vld [vmem:[#allocation8 + $0x50] sm:$0xff]  ;;  %v465_v16 = vld [vmem:[#allocation8 + $0xe8] sm:$0xff]  ;;  %v354_v52 = vshrl.u32 %v353_v51, 7 }
  0x88   :  { %1040 = vmatprep.subr.bf16.mxu1 %v1346_v0  ;;  %v444_v7 = vld [vmem:[#allocation8 + $0x40] sm:$0xff]  ;;  %v449_v25 = vld [vmem:[#allocation8 + $0x68] sm:$0xff]  ;;  %v467_v28 = vld [vmem:[#allocation8 + $0xf8] sm:$0xff] }
  0x89   :  { %1018 = vmatpush3.bf16.msra.mxu0 %v1017_v39  ;;  %v348_v39 = vld [vmem:[#allocation7 + $0xe0] sm:$0xff]  ;;  %v548_v37 = vld [vmem:[#allocation10 + $0x18] sm:$0xff] }
  0x8a   :  { %1019 = vmatprep.subr.bf16.mxu0 %v1346_v0  ;;  %v1076_v41 = vpack.c.bf16 %v350_v40, %v348_v39  ;;  %v751_v19 = vld [vmem:[%s1606_s4] ss:$0 sm:$0xff]  ;;  %v550_v40 = vld [vmem:[#allocation10 + $0x28] sm:$0xff] }
  0x8b   :  { %1042 = vmatpush3.bf16.msra.mxu1 %v1041_v46  ;;  %v437_v46 = vld [vmem:[#allocation8 + $0x8] sm:$0xff]  ;;  %v448_v24 = vld [vmem:[#allocation8 + $0x60] sm:$0xff] }
  0x8c   :  { %1043 = vmatprep.subr.bf16.mxu1 %v1346_v0  ;;  %v1080_v49 = vpack.c.bf16 %v437_v46, %v436_v44  ;;  %v549_v39 = vld [vmem:[#allocation10 + $0x20] sm:$0xff]  ;;  %v554_v46 = vld [vmem:[#allocation10 + $0x48] sm:$0xff] }
  0x8d   :  { %1021 = vmatpush3.bf16.msra.mxu0 %v1020_v45  ;;  %v1078_v45 = vpack.c.bf16 %v453_v43, %v452_v42  ;;  %v551_v42 = vld [vmem:[#allocation10 + $0x30] sm:$0xff]  ;;  %v552_v43 = vld [vmem:[#allocation10 + $0x38] sm:$0xff] }
  0x8e   :  { %1047 = vmatprep.subr.bf16.mxu0 %v1046_v54  ;;  %v457_v54 = vld [vmem:[#allocation8 + $0xa8] sm:$0xff]  ;;  %v1120_v44 = vpack.c.bf16 %v552_v43, %v551_v42 }
  0x8f   :  { %1045 = vmatpush3.bf16.msra.mxu1 %v1044_v50  ;;  %v1086_v56 = vpack.c.bf16 %v457_v54, %v456_v53  ;;  %v355_v53 = vsub.s32 0, %v354_v52  ;;  %v129_v54 = vld [vmem:[%s1608_s6] sm:$0x3] }
  0x90   :  { %891 = vmatmul.mubr.f32.vlgmr.msra.gmra.mrb[0].mxu0 %v133_v47  ;;  %v454_v47 = vld [vmem:[#allocation8 + $0x90] sm:$0xff]  ;;  %1079 = vmatprep.subr.bf16.mxu1 %v1078_v45  ;;  %v553_v45 = vld [vmem:[#allocation10 + $0x40] sm:$0xff] }
  0x91   :  { %427 = vmatprep.mubr.f32.mxu0 %v1348_v1  ;;  %1049 = vmatpush1.bf16.msra.mxu0 %v1048_v58  ;;  %v1082_v50 = vpack.c.bf16 %v455_v48, %v454_v47  ;;  %v441_v58 = vld [vmem:[#allocation8 + $0x28] sm:$0xff]  ;;  %v1123_v47 = vpack.c.bf16 %v554_v46, %v553_v45  ;;  %v555_v48 = vld [vmem:[#allocation10 + $0x50] sm:$0xff] }
  0x92   :  { %1051 = vmatprep.subr.bf16.mxu0 %v1050_v59  ;;  %v458_v59 = vld [vmem:[#allocation8 + $0xb0] sm:$0xff]  ;;  %v1088_v61 = vpack.c.bf16 %v441_v58, %v440_v57 }
  0x93   :  { %v1090_v62 = vpack.c.bf16 %v459_v60, %v458_v59 }
  0x95   :  { %1053 = vmatpush1.bf16.msra.mxu0 %v1052_v2  ;;  %v443_v2 = vld [vmem:[#allocation8 + $0x38] sm:$0xff] }
  0x96   :  { %1055 = vmatprep.subr.bf16.mxu0 %v1054_v3  ;;  %v460_v3 = vld [vmem:[#allocation8 + $0xc0] sm:$0xff]  ;;  %v1092_v5 = vpack.c.bf16 %v443_v2, %v442_v63 }
  0x97   :  { %v1094_v6 = vpack.c.bf16 %v461_v4, %v460_v3  ;;  %v557_v2 = vld [vmem:[#allocation10 + $0x60] sm:$0xff]  ;;  %v558_v3 = vld [vmem:[#allocation10 + $0x68] sm:$0xff] }
  0x98   :  { %v1129_v4 = vpack.c.bf16 %v558_v3, %v557_v2 }
  0x99   :  { %1057 = vmatpush1.bf16.msra.mxu0 %v1056_v8  ;;  %v445_v8 = vld [vmem:[#allocation8 + $0x48] sm:$0xff] }
  0x9a   :  { %1059 = vmatprep.subr.bf16.mxu0 %v1058_v9  ;;  %v462_v9 = vld [vmem:[#allocation8 + $0xd0] sm:$0xff]  ;;  %v1096_v11 = vpack.c.bf16 %v445_v8, %v444_v7  ;;  %v638_v8 = vld [vmem:[#allocation11] sm:$0xff] }
  0x9b   :  { %v1098_v12 = vpack.c.bf16 %v463_v10, %v462_v9  ;;  %v639_v9 = vld [vmem:[#allocation11 + $0x8] sm:$0xff]  ;;  %v640_v10 = vld [vmem:[#allocation11 + $0x10] sm:$0xff] }
  0x9d   :  { %1061 = vmatpush1.bf16.msra.mxu0 %v1060_v14  ;;  %v447_v14 = vld [vmem:[#allocation8 + $0x58] sm:$0xff] }
  0x9e   :  { %1063 = vmatprep.subr.bf16.mxu0 %v1062_v15  ;;  %v464_v15 = vld [vmem:[#allocation8 + $0xe0] sm:$0xff]  ;;  %v1100_v17 = vpack.c.bf16 %v447_v14, %v446_v13  ;;  %v643_v14 = vld [vmem:[#allocation11 + $0x28] sm:$0xff] }
  0x9f   :  { %v1102_v18 = vpack.c.bf16 %v465_v16, %v464_v15  ;;  %v644_v16 = vld [vmem:[#allocation11 + $0x30] sm:$0xff] }
  0xa1   :  { %1065 = vmatpush1.bf16.msra.mxu0 %v1064_v20 }
  0xa2   :  { %1067 = vmatprep.subr.bf16.mxu0 %v1066_v21 }
  0xa5   :  { %1069 = vmatpush1.bf16.msra.mxu0 %v1068_v26  ;;  %v1104_v26 = vpack.c.bf16 %v449_v25, %v448_v24  ;;  %v650_v25 = vld [vmem:[#allocation11 + $0x60] sm:$0xff] }
  0xa6   :  { %1071 = vmatprep.subr.bf16.mxu0 %v1070_v27  ;;  %v466_v27 = vld [vmem:[#allocation8 + $0xf0] sm:$0xff] }
  0xa7   :  { %v1106_v29 = vpack.c.bf16 %v467_v28, %v466_v27 }
  0xa9   :  { %1073 = vmatpush1.bf16.msra.mxu0 %v1072_v30  ;;  %v450_v30 = vld [vmem:[#allocation8 + $0x70] sm:$0xff] }
  0xaa   :  { %1075 = vmatprep.subr.bf16.mxu0 %v1074_v38 }
  0xad   :  { %1077 = vmatpush1.bf16.msra.mxu0 %v1076_v41  ;;  %v1117_v41 = vpack.c.bf16 %v550_v40, %v549_v39 }
  0xae   :  { %1110 = vmatprep.subr.bf16.mxu0 %v1346_v0 }
 0x163   :  { %v222_v32 = vpop.f32.mrb[0].mxu0 }
 0x164   :  { %v223_v33 = vadd.f32 %v750_v31, %v222_v32  ;;  %v892_v34 = vpop.f32.mrb[1].mxu0  ;;  %v451_v31 = vld [vmem:[#allocation8 + $0x78] sm:$0xff] }
 0x165   :  { %v1108_v32 = vpack.c.bf16 %v451_v31, %v450_v30  ;;  %v546_v34 = vld [vmem:[#allocation10 + $0x8] sm:$0xff] }
 0x166   :  { %v226_v35 = vmax.f32 %v223_v33, 0.0  ;;  %v545_v33 = vld [vmem:[#allocation10] sm:$0xff] }
 0x167   :  { %v1111_v36 = vpack.c.bf16 %v546_v34, %v545_v33  ;;  %v652_v34 = vld [vmem:[#allocation11 + $0x70] sm:$0xff] }
 0x168   :  { %926 = vmatmul.mubr.f32.vlgmr.msra.gmra.mrb[0].mxu1 %v226_v35  ;;  %v547_v35 = vld [vmem:[#allocation10 + $0x10] sm:$0xff] }
 0x169   :  { %1081 = vmatpush3.bf16.msra.mxu1 %v1080_v49  ;;  %v1114_v38 = vpack.c.bf16 %v548_v37, %v547_v35  ;;  %v556_v49 = vld [vmem:[#allocation10 + $0x58] sm:$0xff]  ;;  %v753_v37 = vld [vmem:[%s1612_s10] ss:$0 sm:$0xff] }
 0x16a   :  { %1083 = vmatprep.subr.bf16.mxu1 %v1082_v50  ;;  %v1126_v50 = vpack.c.bf16 %v556_v49, %v555_v48  ;;  %v653_v35 = vld [vmem:[#allocation11 + $0x78] sm:$0xff] }
 0x16d   :  { %1085 = vmatpush3.bf16.msra.mxu1 %v1084_v55  ;;  %v359_v55 = vsub.s32 1, %v354_v52 }
 0x16e   :  { %1087 = vmatprep.subr.bf16.mxu1 %v1086_v56  ;;  %v356_v56 = vrot.slane %v129_v54, %v355_v53 }
 0x16f   :  { %v360_v57 = vrot.slane %v129_v54, %v359_v55 }
 0x171   :  { %1089 = vmatpush3.bf16.msra.mxu1 %v1088_v61 }
 0x172   :  { %1091 = vmatprep.subr.bf16.mxu1 %v1090_v62 }
 0x175   :  { %1093 = vmatpush3.bf16.msra.mxu1 %v1092_v5  ;;  %v559_v5 = vld [vmem:[#allocation10 + $0x70] sm:$0xff] }
 0x176   :  { %1095 = vmatprep.subr.bf16.mxu1 %v1094_v6  ;;  %v560_v6 = vld [vmem:[#allocation10 + $0x78] sm:$0xff] }
 0x177   :  { %v1132_v7 = vpack.c.bf16 %v560_v6, %v559_v5 }
 0x179   :  { %1097 = vmatpush3.bf16.msra.mxu1 %v1096_v11  ;;  %v1135_v11 = vpack.c.bf16 %v639_v9, %v638_v8 }
 0x17a   :  { %1099 = vmatprep.subr.bf16.mxu1 %v1098_v12  ;;  %v641_v12 = vld [vmem:[#allocation11 + $0x18] sm:$0xff] }
 0x17b   :  { %v1138_v13 = vpack.c.bf16 %v641_v12, %v640_v10 }
 0x17d   :  { %1101 = vmatpush3.bf16.msra.mxu1 %v1100_v17  ;;  %v645_v17 = vld [vmem:[#allocation11 + $0x38] sm:$0xff] }
 0x17e   :  { %1103 = vmatprep.subr.bf16.mxu1 %v1102_v18  ;;  %v1144_v18 = vpack.c.bf16 %v645_v17, %v644_v16 }
 0x181   :  { %1105 = vmatpush3.bf16.msra.mxu1 %v1104_v26  ;;  %v651_v26 = vld [vmem:[#allocation11 + $0x68] sm:$0xff] }
 0x182   :  { %1107 = vmatprep.subr.bf16.mxu1 %v1106_v29  ;;  %v1153_v27 = vpack.c.bf16 %v651_v26, %v650_v25  ;;  %v752_v29 = vld [vmem:[%s1610_s8] ss:$0 sm:$0xff] }
 0x185   :  { %1109 = vmatpush3.bf16.msra.mxu1 %v1108_v32 }
 0x186   :  { %1134 = vmatprep.subr.bf16.mxu1 %v1346_v0 }
 0x23b   :  { %v315_v20 = vpop.f32.mrb[0].mxu1 }
 0x23c   :  { %v316_v21 = vadd.f32 %v751_v19, %v315_v20  ;;  %v927_v22 = vpop.f32.mrb[1].mxu1  ;;  %v646_v19 = vld [vmem:[#allocation11 + $0x40] sm:$0xff]  ;;  %v647_v20 = vld [vmem:[#allocation11 + $0x48] sm:$0xff] }
 0x23d   :  { %v648_v22 = vld [vmem:[#allocation11 + $0x50] sm:$0xff] }
 0x23e   :  { %v319_v23 = vmax.f32 %v316_v21, 0.0  ;;  %v1147_v21 = vpack.c.bf16 %v647_v20, %v646_v19 }
 0x240   :  { %428 = vmatmul.mubr.f32.vlgmr.msra.gmra.mrb[2].mxu0 %v319_v23  ;;  %v649_v23 = vld [vmem:[#allocation11 + $0x58] sm:$0xff] }
 0x241   :  { %960 = vmatprep.mubr.msk.f32.mxu0 %vm1347_vm0, %v1348_v1  ;;  %1112 = vmatpush3.bf16.msra.mxu0 %v1111_v36  ;;  %v1150_v24 = vpack.c.bf16 %v649_v23, %v648_v22  ;;  %v1156_v36 = vpack.c.bf16 %v653_v35, %v652_v34 }
 0x242   :  { %1113 = vmatprep.subr.bf16.mxu0 %v1346_v0 }
 0x245   :  { %1115 = vmatpush3.bf16.msra.mxu0 %v1114_v38 }
 0x246   :  { %1116 = vmatprep.subr.bf16.mxu0 %v1346_v0 }
 0x249   :  { %1118 = vmatpush3.bf16.msra.mxu0 %v1117_v41  ;;  %v754_v41 = vld [vmem:[%s1614_s12] ss:$0 sm:$0xff] }
 0x24a   :  { %1119 = vmatprep.subr.bf16.mxu0 %v1346_v0 }
 0x24d   :  { %1121 = vmatpush3.bf16.msra.mxu0 %v1120_v44 }
 0x24e   :  { %1122 = vmatprep.subr.bf16.mxu0 %v1346_v0 }
 0x251   :  { %1124 = vmatpush3.bf16.msra.mxu0 %v1123_v47 }
 0x252   :  { %1125 = vmatprep.subr.bf16.mxu0 %v1346_v0 }
 0x255   :  { %1127 = vmatpush3.bf16.msra.mxu0 %v1126_v50 }
 0x256   :  { %1128 = vmatprep.subr.bf16.mxu0 %v1346_v0 }
 0x259   :  { %1130 = vmatpush3.bf16.msra.mxu0 %v1129_v4 }
 0x25a   :  { %1131 = vmatprep.subr.bf16.mxu0 %v1346_v0 }
 0x25d   :  { %1133 = vmatpush3.bf16.msra.mxu0 %v1132_v7 }
 0x313   :  { %v429_v58 = vpop.f32.mrb[2].mxu0 }
 0x314   :  { %v430_v59 = vadd.f32 %v429_v58, %v356_v56  ;;  %v431_v60 = vpop.f32.mrb[3].mxu0 }
 0x315   :  { %v432_v61 = vadd.f32 %v431_v60, %v360_v57 }
 0x316   :  { %v434_v63 = vmax.f32 %v430_v59, 0.0 }
 0x317   :  { %v435_v62 = vmax.f32 %v432_v61, 0.0 }
 0x319   :  { %538 = vmatprep.mubr.f32.mxu1 %v435_v62 }
 0x31a   :  { %539 = vmatmul.mubr.f32.vlgmr.msra.gmra.mrb[2].mxu1 %v434_v63 }
 0x31b   :  { %995 = vmatprep.mubr.msk.f32.mxu1 %vm1347_vm0, %v1348_v1  ;;  %1136 = vmatpush3.bf16.msra.mxu1 %v1135_v11  ;;  %v642_v1 = vld [vmem:[#allocation11 + $0x20] sm:$0xff] }
 0x31c   :  { %1137 = vmatprep.subr.bf16.mxu1 %v1346_v0  ;;  %v1141_v15 = vpack.c.bf16 %v643_v14, %v642_v1 }
 0x31f   :  { %1139 = vmatpush3.bf16.msra.mxu1 %v1138_v13 }
 0x320   :  { %1140 = vmatprep.subr.bf16.mxu1 %v1346_v0 }
 0x323   :  { %1142 = vmatpush3.bf16.msra.mxu1 %v1141_v15 }
 0x324   :  { %1143 = vmatprep.subr.bf16.mxu1 %v1346_v0 }
 0x327   :  { %1145 = vmatpush3.bf16.msra.mxu1 %v1144_v18 }
 0x328   :  { %1146 = vmatprep.subr.bf16.mxu1 %v1346_v0 }
 0x32b   :  { %1148 = vmatpush3.bf16.msra.mxu1 %v1147_v21 }
 0x32c   :  { %1149 = vmatprep.subr.bf16.mxu1 %v1346_v0 }
 0x32f   :  { %1151 = vmatpush3.bf16.msra.mxu1 %v1150_v24 }
 0x330   :  { %1152 = vmatprep.subr.bf16.mxu1 %v1346_v0 }
 0x333   :  { %1154 = vmatpush3.bf16.msra.mxu1 %v1153_v27 }
 0x334   :  { %1155 = vmatprep.subr.bf16.mxu1 %v1346_v0 }
 0x337   :  { %1157 = vmatpush3.bf16.msra.mxu1 %v1156_v36 }
 0x3ed   :  { %v821_v28 = vpop.f32.mrb[2].mxu1 }
 0x3ee   :  { %v822_v30 = vpop.f32.mrb[3].mxu1 }
 0x3ef   :  { %v823_v31 = vadd.f32 %v822_v30, %v821_v28 }
 0x3f1   :  { %v541_v32 = vadd.f32 %v823_v31, %v752_v29 }
 0x3f3   :  { %v544_v33 = vmax.f32 %v541_v32, 0.0 }
 0x3f5   :  { %961 = vmatmul.mubr.f32.vlgmr.msra.gmra.mrb[4].mxu0 %v544_v33 }
 0x4c8   :  { %v633_v38 = vpop.f32.mrb[4].mxu0 }
 0x4c9   :  { %v634_v0 = vadd.f32 %v753_v37, %v633_v38  ;;  %v962_v39 = vpop.f32.mrb[5].mxu0 }
 0x4cb   :  { %v637_v40 = vmax.f32 %v634_v0, 0.0 }
 0x4cd   :  { %996 = vmatmul.mubr.f32.vlgmr.msra.gmra.mrb[4].mxu1 %v637_v40 }
 0x5a0   :  { %v726_v42 = vpop.f32.mrb[4].mxu1 }
 0x5a1   :  { %v727_v43 = vadd.f32 %v754_v41, %v726_v42  ;;  %v997_v44 = vpop.f32.mrb[5].mxu1 }
 0x5a3   :  { %v730_v45 = vmax.f32 %v727_v43, 0.0 }
 0x5a5   :  { %731 = vst [vmem:[#allocation13] sm:$0xff] %v730_v45 }
 0x5a6   :  { %1315 = shalt.err (!%p1312_p10)
}
 0x5a7   :  { %s1316_s25 = scalar_lea.hbm %s1615_s13, 128 }
 0x5a8   :  { %p1317_p11 = scmp.ne.s32.totalorder %s1615_s13, %s1316_s25  ;;  %p1320_p12 = scmp.lt.u32.totalorder %s1316_s25, %s1615_s13 }
 0x5aa   :  { %p1322_p13 = pnand %p1320_p12, %p1317_p11 }
 0x5ac   :  { %1325 = shalt.err (!%p1322_p13)
}
 0x5ad   :  { %741 = dma.vmem_to_hbm [thread:$0]  %s739_s5, 128, %s1615_s13, [#allocation4]  }
 0x5ae   :  { %1334 = dma.done.wait [#allocation4], 128  }
 0x5af   :  { %1335 = vsyncadd [#allocation4], 4294967168 }
 0x5b0   :  { %745 = vsyncpa [#allocation3], 1 }
 0x5b1   :  { %746 = vsyncpa [#allocation6], 1 }
 0x5b2   :  { %747 = vsyncpa [#allocation9], 1 }
 0x5b3   :  { %748 = vsyncpa [#allocation12], 1 }
 0x5b4   :  { %749 = vsyncpa [#allocation4], 1 }

</bundles_post_ra>
